<compile_context>
chip_gen: v5e
topology: v5e:2x2
jax: 0.10.0
libtpu: 0.0.40
codegen_flags: <defaults>
</compile_context>

<pallas_src>
import functools

import jax
import jax.numpy as jnp
from jax.experimental import pallas as pl
from jax.experimental.pallas import tpu as pltpu


_VMEM = pl.BlockSpec(memory_space=pltpu.MemorySpace.VMEM)


# ----------------------------------------------------------------------------
# Shared in-kernel LSTM direction (fully unrolled, h/c in vregs).
# ----------------------------------------------------------------------------
def _lstm_direction(x2, w_ih, w_hh, b, *, T, B, H, reverse, write_h):
    """One LSTM direction over a time-major flattened sequence.

    x2:    (T*B, I) value, row r = t*B + b (already resident in VMEM).
    w_ih:  (I, 4H), w_hh: (H, 4H), b: (1, 4H); gate layout [i, f, o, g].
    write_h(t, h) is called with the (B, H) hidden state for each time step.
    """
    # Hoisted input projection: one MXU call for all T timesteps.
    gx = jnp.dot(x2, w_ih, preferred_element_type=jnp.float32) + b        # (T*B, 4H)
    h = jnp.zeros((B, H), jnp.float32)
    c = jnp.zeros((B, H), jnp.float32)
    order = range(T - 1, -1, -1) if reverse else range(T)
    for t in order:                      # static unroll == fori_loop(unroll=True)
        g = gx[t * B:(t + 1) * B, :] + jnp.dot(h, w_hh,
                                               preferred_element_type=jnp.float32)
        sig = jax.nn.sigmoid(g[:, :3 * H])          # i | f | o   (one 96-lane sigmoid)
        gg = jnp.tanh(g[:, 3 * H:])                 # g           (one 32-lane tanh)
        c = sig[:, H:2 * H] * c + sig[:, :H] * gg
        h = sig[:, 2 * H:3 * H] * jnp.tanh(c)
        write_h(t, h)


# ----------------------------------------------------------------------------
# LSTM-only kernel for non-final layers (only used when num_lstm_layers > 1).
# ----------------------------------------------------------------------------
def lstm_layer_kernel(x_ref, w_ih_ref, w_hh_ref, b_ref, out_ref,
                      *, T, B, H, num_dirs):
    """out_ref: (T*B, num_dirs*H) time-major rows (VMEM, flushed to HBM once)."""
    x2 = x_ref[...]
    for d in range(num_dirs):
        def write(t, h, d=d):
            out_ref[t * B:(t + 1) * B, d * H:(d + 1) * H] = h
        _lstm_direction(x2, w_ih_ref[d], w_hh_ref[d], b_ref[d],
                        T=T, B=B, H=H, reverse=(d == 1), write_h=write)


# ----------------------------------------------------------------------------
# Fused kernel: final LSTM layer + attention + fc(+ReLU) + MDN heads.
# ----------------------------------------------------------------------------
def var_fused_kernel(x_ref, w_ih_ref, w_hh_ref, b_ref,
                     w_head_ref, b_fc_ref, w_mdn_ref, b_mdn_ref,
                     mdn_ref, attn_ref, lo_scr,
                     *, T, B, H, num_dirs, mdn, nc):
    """lstm_out never leaves VMEM: accumulated in lo_scr (B, T, num_dirs*H)."""
    x2 = x_ref[...]
    for d in range(num_dirs):
        def write(t, h, d=d):
            lo_scr[:, t, d * H:(d + 1) * H] = h
        _lstm_direction(x2, w_ih_ref[d], w_hh_ref[d], b_ref[d],
                        T=T, B=B, H=H, reverse=(d == 1), write_h=write)

    lo = lo_scr[...]                                   # (B, T, HD)
    wh = w_head_ref[...]                               # (HD, mdn+1) = [w_fc | w_att]

    # Attention.  The attention bias is constant across the softmax (time) axis, so it
    # cancels exactly in softmax (and the module initializes it to zero anyway).
    logits = jnp.sum(lo * wh[:, mdn], axis=-1)         # (B, T)
    logits = logits - jnp.max(logits, axis=-1, keepdims=True)
    e = jnp.exp(logits)
    aw = e / jnp.sum(e, axis=-1, keepdims=True)        # (B, T)
    context = jnp.sum(aw[:, :, None] * lo, axis=1)     # (B, HD)

    # fc -> ReLU (dropout is identity at inference).
    feats = jnp.maximum(
        jnp.dot(context, wh[:, :mdn], preferred_element_type=jnp.float32)
        + b_fc_ref[...], 0.0)                          # (B, mdn)

    # MDN heads: one packed matmul for pi | mu | sigma.
    z = jnp.dot(feats, w_mdn_ref[...], preferred_element_type=jnp.float32) + b_mdn_ref[...]
    pil = z[:, :nc]
    pil = pil - jnp.max(pil, axis=-1, keepdims=True)
    pe = jnp.exp(pil)
    pi = pe / jnp.sum(pe, axis=-1, keepdims=True)
    mu = z[:, nc:2 * nc]
    sg = jnp.clip(jnp.exp(z[:, 2 * nc:]), 0.001, 1000.0)

    mdn_ref[...] = jnp.concatenate([pi, mu, sg], axis=-1).astype(mdn_ref.dtype)
    attn_ref[...] = aw.astype(attn_ref.dtype)          # (B, T)


# ----------------------------------------------------------------------------
# pallas_call wrappers.
# ----------------------------------------------------------------------------
def lstm_layer_pallas(x2, layer, *, T, B):
    num_dirs, _, four_h = layer["w_ih_t"].shape
    H = four_h // 4
    kern = functools.partial(lstm_layer_kernel, T=T, B=B, H=H, num_dirs=num_dirs)
    return pl.pallas_call(
        kern,
        out_shape=jax.ShapeDtypeStruct((T * B, num_dirs * H), jnp.float32),
        in_specs=[_VMEM] * 4,
        out_specs=_VMEM,
    )(x2, layer["w_ih_t"], layer["w_hh_t"], layer["b"])


def var_head_pallas(x2, layer, p, *, T, B):
    num_dirs, _, four_h = layer["w_ih_t"].shape
    H = four_h // 4
    mdn = p["b_fc"].shape[1]
    nc = p["w_mdn_t"].shape[1] // 3
    kern = functools.partial(var_fused_kernel, T=T, B=B, H=H,
                             num_dirs=num_dirs, mdn=mdn, nc=nc)
    return pl.pallas_call(
        kern,
        out_shape=(jax.ShapeDtypeStruct((B, 3 * nc), jnp.float32),   # [pi | mu | sigma]
                   jax.ShapeDtypeStruct((B, T), jnp.float32)),       # attn_weights
        in_specs=[_VMEM] * 8,
        out_specs=(_VMEM, _VMEM),
        scratch_shapes=[pltpu.VMEM((B, T, num_dirs * H), jnp.float32)],
    )(x2, layer["w_ih_t"], layer["w_hh_t"], layer["b"],
      p["w_head"], p["b_fc"], p["w_mdn_t"], p["b_mdn"])


# ----------------------------------------------------------------------------
# Parameter construction (deterministic, shapes from the module's __init__).
# ----------------------------------------------------------------------------
def xavier_uniform(key, shape):
    fan_out, fan_in = shape
    bound = (6.0 / (fan_in + fan_out)) ** 0.5
    return jax.random.uniform(key, shape, jnp.float32, -bound, bound)


def _permute_gates(w, H):
    # PyTorch gate row order [i, f, g, o] -> [i, f, o, g] (sigmoid gates contiguous).
    return jnp.concatenate([w[:2 * H], w[3 * H:], w[2 * H:3 * H]], axis=0)


def make_params(key, input_size, num_layers, hidden, mdn_size, n_comp, bidirectional):
    num_dirs = 2 if bidirectional else 1
    lstm_out_size = hidden * num_dirs
    k = 1.0 / (hidden ** 0.5)
    params = {"lstm": []}

    for layer in range(num_layers):
        in_sz = input_size if layer == 0 else lstm_out_size
        wih, whh, bb = [], [], []
        for _ in range(num_dirs):
            key, k1, k2, k3, k4 = jax.random.split(key, 5)
            w_ih = jax.random.uniform(k1, (4 * hidden, in_sz), jnp.float32, -k, k)
            w_hh = jax.random.uniform(k2, (4 * hidden, hidden), jnp.float32, -k, k)
            b_ih = jax.random.uniform(k3, (4 * hidden,), jnp.float32, -k, k)
            b_hh = jax.random.uniform(k4, (4 * hidden,), jnp.float32, -k, k)
            wih.append(_permute_gates(w_ih, hidden).T)                       # (in, 4H)
            whh.append(_permute_gates(w_hh, hidden).T)                       # (H, 4H)
            bb.append(_permute_gates((b_ih + b_hh).reshape(4 * hidden, 1), hidden).T)
        params["lstm"].append({
            "w_ih_t": jnp.stack(wih, axis=0),    # (dirs, in, 4H)
            "w_hh_t": jnp.stack(whh, axis=0),    # (dirs, H, 4H)
            "b": jnp.stack(bb, axis=0),          # (dirs, 1, 4H)
        })

    key, k_att, k_fc, k_pi, k_mu, k_sg = jax.random.split(key, 6)
    w_att = xavier_uniform(k_att, (1, lstm_out_size))          # attention bias = 0 (cancels)
    w_fc = xavier_uniform(k_fc, (mdn_size, lstm_out_size))
    params["w_head"] = jnp.concatenate([w_fc.T, w_att.T], axis=1)   # (HD, mdn+1)
    params["b_fc"] = jnp.zeros((1, mdn_size), jnp.float32)
    w_pi = xavier_uniform(k_pi, (n_comp, mdn_size))
    w_mu = xavier_uniform(k_mu, (n_comp, mdn_size))
    w_sg = xavier_uniform(k_sg, (n_comp, mdn_size))
    params["w_mdn_t"] = jnp.concatenate([w_pi.T, w_mu.T, w_sg.T], axis=1)  # (mdn, 3*nc)
    params["b_mdn"] = jnp.zeros((1, 3 * n_comp), jnp.float32)
    return params


# ----------------------------------------------------------------------------
# Full forward pass.
# ----------------------------------------------------------------------------
@jax.jit
def var_model_forward(x, params):
    """x: (B, T, input_size) batch-first, like the PyTorch module."""
    B, T, F = x.shape
    # Time-major flattened rows (row = t*B + b); one tiny one-time XLA relayout,
    # so per-timestep gate slices inside the kernel are plain static 2-D slices.
    h2 = jnp.transpose(x, (1, 0, 2)).reshape(T * B, F).astype(jnp.float32)

    layers = params["lstm"]
    for layer in layers[:-1]:                       # non-final stacked layers (if any)
        h2 = lstm_layer_pallas(h2, layer, T=T, B=B)

    packed, attn_weights = var_head_pallas(h2, layers[-1], params, T=T, B=B)
    nc = params["w_mdn_t"].shape[1] // 3
    pi = packed[:, :nc]
    mu = packed[:, nc:2 * nc]
    sigma = packed[:, 2 * nc:]
    # TODO(synk): dropout in `fc` is treated as identity (inference mode).
    return pi, mu, sigma, attn_weights


if __name__ == "__main__":
    # Module config
    INPUT_SIZE = 8
    NUM_LSTM_LAYERS = 1
    HIDDEN_SIZE = 32
    MDN_SIZE = 16
    N_COMPONENTS = 3
    BIDIRECTIONAL = False

    # NOTE: production batches should pad B to a multiple of 8 (sublanes); B=2 here only
    # exercises 2/8 sublanes of every vreg.
    B, T = 2, 8

    key = jax.random.PRNGKey(0)
    key, k_x, k_p = jax.random.split(key, 3)
    x = jax.random.normal(k_x, (B, T, INPUT_SIZE), jnp.float32)
    params = make_params(k_p, INPUT_SIZE, NUM_LSTM_LAYERS, HIDDEN_SIZE,
                         MDN_SIZE, N_COMPONENTS, BIDIRECTIONAL)

    pi, mu, sigma, attn_weights = var_model_forward(x, params)
    jax.block_until_ready((pi, mu, sigma, attn_weights))

    assert pi.shape == (B, N_COMPONENTS)
    assert mu.shape == (B, N_COMPONENTS)
    assert sigma.shape == (B, N_COMPONENTS)
    assert attn_weights.shape == (B, T)

    print("KERNEL_OK")
</pallas_src>

<mosaic_0001>
module attributes {stable_mosaic.version = 11 : i64} {
  func.func @var_fused_kernel(%arg0: memref<16x8xf32, #tpu.memory_space<vmem>>, %arg1: memref<1x8x128xf32, #tpu.memory_space<vmem>>, %arg2: memref<1x32x128xf32, #tpu.memory_space<vmem>>, %arg3: memref<1x1x128xf32, #tpu.memory_space<vmem>>, %arg4: memref<32x17xf32, #tpu.memory_space<vmem>>, %arg5: memref<1x16xf32, #tpu.memory_space<vmem>>, %arg6: memref<16x9xf32, #tpu.memory_space<vmem>>, %arg7: memref<1x9xf32, #tpu.memory_space<vmem>>, %arg8: memref<2x9xf32, #tpu.memory_space<vmem>>, %arg9: memref<2x8xf32, #tpu.memory_space<vmem>>, %arg10: memref<2x8x32xf32, #tpu.memory_space<vmem>>) attributes {dimension_semantics = [], scalar_prefetch = 0 : i64, scratch_operands = 1 : i64, tpu.core_type = #tpu.core_type<tc>} {
    %c0 = arith.constant 0 : index
    %c0_0 = arith.constant 0 : index
    %0 = vector.load %arg0[%c0, %c0_0] : memref<16x8xf32, #tpu.memory_space<vmem>>, vector<16x8xf32>
    %c0_1 = arith.constant 0 : index
    %c0_2 = arith.constant 0 : index
    %c0_3 = arith.constant 0 : index
    %1 = vector.load %arg1[%c0_1, %c0_2, %c0_3] : memref<1x8x128xf32, #tpu.memory_space<vmem>>, vector<1x8x128xf32>
    %2 = vector.shape_cast %1 : vector<1x8x128xf32> to vector<8x128xf32>
    %c0_4 = arith.constant 0 : index
    %c0_5 = arith.constant 0 : index
    %c0_6 = arith.constant 0 : index
    %3 = vector.load %arg2[%c0_4, %c0_5, %c0_6] : memref<1x32x128xf32, #tpu.memory_space<vmem>>, vector<1x32x128xf32>
    %4 = vector.shape_cast %3 : vector<1x32x128xf32> to vector<32x128xf32>
    %c0_7 = arith.constant 0 : index
    %c0_8 = arith.constant 0 : index
    %c0_9 = arith.constant 0 : index
    %5 = vector.load %arg3[%c0_7, %c0_8, %c0_9] : memref<1x1x128xf32, #tpu.memory_space<vmem>>, vector<1x1x128xf32>
    %6 = vector.shape_cast %5 : vector<1x1x128xf32> to vector<1x128xf32>
    %cst = arith.constant dense<0.000000e+00> : vector<16x128xf32>
    %7 = tpu.matmul %0, %2, %cst {dimension_numbers = #tpu.dot_dimension_numbers<[1], [0], [0], [1], [0, 0, 1, 1], [], []>} : vector<16x8xf32>, vector<8x128xf32>, vector<16x128xf32> -> vector<16x128xf32>
    %8 = vector.broadcast %6 : vector<1x128xf32> to vector<16x128xf32>
    %9 = arith.addf %7, %8 : vector<16x128xf32>
    %cst_10 = arith.constant 0.000000e+00 : f32
    %10 = vector.broadcast %cst_10 : f32 to vector<2x32xf32>
    %cst_11 = arith.constant 0.000000e+00 : f32
    %11 = vector.broadcast %cst_11 : f32 to vector<2x32xf32>
    %12 = vector.extract_strided_slice %9 {offsets = [0, 0], sizes = [2, 128], strides = [1, 1]} : vector<16x128xf32> to vector<2x128xf32>
    %cst_12 = arith.constant dense<0.000000e+00> : vector<2x128xf32>
    %13 = tpu.matmul %10, %4, %cst_12 {dimension_numbers = #tpu.dot_dimension_numbers<[1], [0], [0], [1], [0, 0, 1, 1], [], []>} : vector<2x32xf32>, vector<32x128xf32>, vector<2x128xf32> -> vector<2x128xf32>
    %14 = arith.addf %12, %13 : vector<2x128xf32>
    %15 = vector.extract_strided_slice %14 {offsets = [0, 0], sizes = [2, 96], strides = [1, 1]} : vector<2x128xf32> to vector<2x96xf32>
    %16 = arith.negf %15 : vector<2x96xf32>
    %17 = math.exp %16 : vector<2x96xf32>
    %cst_13 = arith.constant 1.000000e+00 : f32
    %18 = vector.broadcast %cst_13 : f32 to vector<2x96xf32>
    %19 = arith.addf %18, %17 : vector<2x96xf32>
    %20 = arith.divf %18, %19 : vector<2x96xf32>
    %21 = vector.extract_strided_slice %14 {offsets = [0, 96], sizes = [2, 32], strides = [1, 1]} : vector<2x128xf32> to vector<2x32xf32>
    %22 = math.tanh %21 : vector<2x32xf32>
    %23 = vector.extract_strided_slice %20 {offsets = [0, 32], sizes = [2, 32], strides = [1, 1]} : vector<2x96xf32> to vector<2x32xf32>
    %24 = arith.mulf %23, %11 : vector<2x32xf32>
    %25 = vector.extract_strided_slice %20 {offsets = [0, 0], sizes = [2, 32], strides = [1, 1]} : vector<2x96xf32> to vector<2x32xf32>
    %26 = arith.mulf %25, %22 : vector<2x32xf32>
    %27 = arith.addf %24, %26 : vector<2x32xf32>
    %28 = vector.extract_strided_slice %20 {offsets = [0, 64], sizes = [2, 32], strides = [1, 1]} : vector<2x96xf32> to vector<2x32xf32>
    %29 = math.tanh %27 : vector<2x32xf32>
    %30 = arith.mulf %28, %29 : vector<2x32xf32>
    %c0_14 = arith.constant 0 : index
    %c0_15 = arith.constant 0 : index
    %c0_16 = arith.constant 0 : index
    %31 = vector.load %arg10[%c0_14, %c0_15, %c0_16] : memref<2x8x32xf32, #tpu.memory_space<vmem>>, vector<2x1x32xf32>
    %32 = vector.shape_cast %31 : vector<2x1x32xf32> to vector<2x32xf32>
    %33 = vector.shape_cast %30 : vector<2x32xf32> to vector<2x1x32xf32>
    tpu.vector_store %arg10[%c0_14, %c0_15, %c0_16], %33 {strides = array<i32>} : memref<2x8x32xf32, #tpu.memory_space<vmem>>, vector<2x1x32xf32>,
    %34 = vector.extract_strided_slice %9 {offsets = [2, 0], sizes = [2, 128], strides = [1, 1]} : vector<16x128xf32> to vector<2x128xf32>
    %cst_17 = arith.constant dense<0.000000e+00> : vector<2x128xf32>
    %35 = tpu.matmul %30, %4, %cst_17 {dimension_numbers = #tpu.dot_dimension_numbers<[1], [0], [0], [1], [0, 0, 1, 1], [], []>} : vector<2x32xf32>, vector<32x128xf32>, vector<2x128xf32> -> vector<2x128xf32>
    %36 = arith.addf %34, %35 : vector<2x128xf32>
    %37 = vector.extract_strided_slice %36 {offsets = [0, 0], sizes = [2, 96], strides = [1, 1]} : vector<2x128xf32> to vector<2x96xf32>
    %38 = arith.negf %37 : vector<2x96xf32>
    %39 = math.exp %38 : vector<2x96xf32>
    %cst_18 = arith.constant 1.000000e+00 : f32
    %40 = vector.broadcast %cst_18 : f32 to vector<2x96xf32>
    %41 = arith.addf %40, %39 : vector<2x96xf32>
    %42 = arith.divf %40, %41 : vector<2x96xf32>
    %43 = vector.extract_strided_slice %36 {offsets = [0, 96], sizes = [2, 32], strides = [1, 1]} : vector<2x128xf32> to vector<2x32xf32>
    %44 = math.tanh %43 : vector<2x32xf32>
    %45 = vector.extract_strided_slice %42 {offsets = [0, 32], sizes = [2, 32], strides = [1, 1]} : vector<2x96xf32> to vector<2x32xf32>
    %46 = arith.mulf %45, %27 : vector<2x32xf32>
    %47 = vector.extract_strided_slice %42 {offsets = [0, 0], sizes = [2, 32], strides = [1, 1]} : vector<2x96xf32> to vector<2x32xf32>
    %48 = arith.mulf %47, %44 : vector<2x32xf32>
    %49 = arith.addf %46, %48 : vector<2x32xf32>
    %50 = vector.extract_strided_slice %42 {offsets = [0, 64], sizes = [2, 32], strides = [1, 1]} : vector<2x96xf32> to vector<2x32xf32>
    %51 = math.tanh %49 : vector<2x32xf32>
    %52 = arith.mulf %50, %51 : vector<2x32xf32>
    %c0_19 = arith.constant 0 : index
    %c1 = arith.constant 1 : index
    %c0_20 = arith.constant 0 : index
    %53 = vector.load %arg10[%c0_19, %c1, %c0_20] : memref<2x8x32xf32, #tpu.memory_space<vmem>>, vector<2x1x32xf32>
    %54 = vector.shape_cast %53 : vector<2x1x32xf32> to vector<2x32xf32>
    %55 = vector.shape_cast %52 : vector<2x32xf32> to vector<2x1x32xf32>
    tpu.vector_store %arg10[%c0_19, %c1, %c0_20], %55 {strides = array<i32>} : memref<2x8x32xf32, #tpu.memory_space<vmem>>, vector<2x1x32xf32>,
    %56 = vector.extract_strided_slice %9 {offsets = [4, 0], sizes = [2, 128], strides = [1, 1]} : vector<16x128xf32> to vector<2x128xf32>
    %cst_21 = arith.constant dense<0.000000e+00> : vector<2x128xf32>
    %57 = tpu.matmul %52, %4, %cst_21 {dimension_numbers = #tpu.dot_dimension_numbers<[1], [0], [0], [1], [0, 0, 1, 1], [], []>} : vector<2x32xf32>, vector<32x128xf32>, vector<2x128xf32> -> vector<2x128xf32>
    %58 = arith.addf %56, %57 : vector<2x128xf32>
    %59 = vector.extract_strided_slice %58 {offsets = [0, 0], sizes = [2, 96], strides = [1, 1]} : vector<2x128xf32> to vector<2x96xf32>
    %60 = arith.negf %59 : vector<2x96xf32>
    %61 = math.exp %60 : vector<2x96xf32>
    %cst_22 = arith.constant 1.000000e+00 : f32
    %62 = vector.broadcast %cst_22 : f32 to vector<2x96xf32>
    %63 = arith.addf %62, %61 : vector<2x96xf32>
    %64 = arith.divf %62, %63 : vector<2x96xf32>
    %65 = vector.extract_strided_slice %58 {offsets = [0, 96], sizes = [2, 32], strides = [1, 1]} : vector<2x128xf32> to vector<2x32xf32>
    %66 = math.tanh %65 : vector<2x32xf32>
    %67 = vector.extract_strided_slice %64 {offsets = [0, 32], sizes = [2, 32], strides = [1, 1]} : vector<2x96xf32> to vector<2x32xf32>
    %68 = arith.mulf %67, %49 : vector<2x32xf32>
    %69 = vector.extract_strided_slice %64 {offsets = [0, 0], sizes = [2, 32], strides = [1, 1]} : vector<2x96xf32> to vector<2x32xf32>
    %70 = arith.mulf %69, %66 : vector<2x32xf32>
    %71 = arith.addf %68, %70 : vector<2x32xf32>
    %72 = vector.extract_strided_slice %64 {offsets = [0, 64], sizes = [2, 32], strides = [1, 1]} : vector<2x96xf32> to vector<2x32xf32>
    %73 = math.tanh %71 : vector<2x32xf32>
    %74 = arith.mulf %72, %73 : vector<2x32xf32>
    %c0_23 = arith.constant 0 : index
    %c2 = arith.constant 2 : index
    %c0_24 = arith.constant 0 : index
    %75 = vector.load %arg10[%c0_23, %c2, %c0_24] : memref<2x8x32xf32, #tpu.memory_space<vmem>>, vector<2x1x32xf32>
    %76 = vector.shape_cast %75 : vector<2x1x32xf32> to vector<2x32xf32>
    %77 = vector.shape_cast %74 : vector<2x32xf32> to vector<2x1x32xf32>
    tpu.vector_store %arg10[%c0_23, %c2, %c0_24], %77 {strides = array<i32>} : memref<2x8x32xf32, #tpu.memory_space<vmem>>, vector<2x1x32xf32>,
    %78 = vector.extract_strided_slice %9 {offsets = [6, 0], sizes = [2, 128], strides = [1, 1]} : vector<16x128xf32> to vector<2x128xf32>
    %cst_25 = arith.constant dense<0.000000e+00> : vector<2x128xf32>
    %79 = tpu.matmul %74, %4, %cst_25 {dimension_numbers = #tpu.dot_dimension_numbers<[1], [0], [0], [1], [0, 0, 1, 1], [], []>} : vector<2x32xf32>, vector<32x128xf32>, vector<2x128xf32> -> vector<2x128xf32>
    %80 = arith.addf %78, %79 : vector<2x128xf32>
    %81 = vector.extract_strided_slice %80 {offsets = [0, 0], sizes = [2, 96], strides = [1, 1]} : vector<2x128xf32> to vector<2x96xf32>
    %82 = arith.negf %81 : vector<2x96xf32>
    %83 = math.exp %82 : vector<2x96xf32>
    %cst_26 = arith.constant 1.000000e+00 : f32
    %84 = vector.broadcast %cst_26 : f32 to vector<2x96xf32>
    %85 = arith.addf %84, %83 : vector<2x96xf32>
    %86 = arith.divf %84, %85 : vector<2x96xf32>
    %87 = vector.extract_strided_slice %80 {offsets = [0, 96], sizes = [2, 32], strides = [1, 1]} : vector<2x128xf32> to vector<2x32xf32>
    %88 = math.tanh %87 : vector<2x32xf32>
    %89 = vector.extract_strided_slice %86 {offsets = [0, 32], sizes = [2, 32], strides = [1, 1]} : vector<2x96xf32> to vector<2x32xf32>
    %90 = arith.mulf %89, %71 : vector<2x32xf32>
    %91 = vector.extract_strided_slice %86 {offsets = [0, 0], sizes = [2, 32], strides = [1, 1]} : vector<2x96xf32> to vector<2x32xf32>
    %92 = arith.mulf %91, %88 : vector<2x32xf32>
    %93 = arith.addf %90, %92 : vector<2x32xf32>
    %94 = vector.extract_strided_slice %86 {offsets = [0, 64], sizes = [2, 32], strides = [1, 1]} : vector<2x96xf32> to vector<2x32xf32>
    %95 = math.tanh %93 : vector<2x32xf32>
    %96 = arith.mulf %94, %95 : vector<2x32xf32>
    %c0_27 = arith.constant 0 : index
    %c3 = arith.constant 3 : index
    %c0_28 = arith.constant 0 : index
    %97 = vector.load %arg10[%c0_27, %c3, %c0_28] : memref<2x8x32xf32, #tpu.memory_space<vmem>>, vector<2x1x32xf32>
    %98 = vector.shape_cast %97 : vector<2x1x32xf32> to vector<2x32xf32>
    %99 = vector.shape_cast %96 : vector<2x32xf32> to vector<2x1x32xf32>
    tpu.vector_store %arg10[%c0_27, %c3, %c0_28], %99 {strides = array<i32>} : memref<2x8x32xf32, #tpu.memory_space<vmem>>, vector<2x1x32xf32>,
    %100 = vector.extract_strided_slice %9 {offsets = [8, 0], sizes = [2, 128], strides = [1, 1]} : vector<16x128xf32> to vector<2x128xf32>
    %cst_29 = arith.constant dense<0.000000e+00> : vector<2x128xf32>
    %101 = tpu.matmul %96, %4, %cst_29 {dimension_numbers = #tpu.dot_dimension_numbers<[1], [0], [0], [1], [0, 0, 1, 1], [], []>} : vector<2x32xf32>, vector<32x128xf32>, vector<2x128xf32> -> vector<2x128xf32>
    %102 = arith.addf %100, %101 : vector<2x128xf32>
    %103 = vector.extract_strided_slice %102 {offsets = [0, 0], sizes = [2, 96], strides = [1, 1]} : vector<2x128xf32> to vector<2x96xf32>
    %104 = arith.negf %103 : vector<2x96xf32>
    %105 = math.exp %104 : vector<2x96xf32>
    %cst_30 = arith.constant 1.000000e+00 : f32
    %106 = vector.broadcast %cst_30 : f32 to vector<2x96xf32>
    %107 = arith.addf %106, %105 : vector<2x96xf32>
    %108 = arith.divf %106, %107 : vector<2x96xf32>
    %109 = vector.extract_strided_slice %102 {offsets = [0, 96], sizes = [2, 32], strides = [1, 1]} : vector<2x128xf32> to vector<2x32xf32>
    %110 = math.tanh %109 : vector<2x32xf32>
    %111 = vector.extract_strided_slice %108 {offsets = [0, 32], sizes = [2, 32], strides = [1, 1]} : vector<2x96xf32> to vector<2x32xf32>
    %112 = arith.mulf %111, %93 : vector<2x32xf32>
    %113 = vector.extract_strided_slice %108 {offsets = [0, 0], sizes = [2, 32], strides = [1, 1]} : vector<2x96xf32> to vector<2x32xf32>
    %114 = arith.mulf %113, %110 : vector<2x32xf32>
    %115 = arith.addf %112, %114 : vector<2x32xf32>
    %116 = vector.extract_strided_slice %108 {offsets = [0, 64], sizes = [2, 32], strides = [1, 1]} : vector<2x96xf32> to vector<2x32xf32>
    %117 = math.tanh %115 : vector<2x32xf32>
    %118 = arith.mulf %116, %117 : vector<2x32xf32>
    %c0_31 = arith.constant 0 : index
    %c4 = arith.constant 4 : index
    %c0_32 = arith.constant 0 : index
    %119 = vector.load %arg10[%c0_31, %c4, %c0_32] : memref<2x8x32xf32, #tpu.memory_space<vmem>>, vector<2x1x32xf32>
    %120 = vector.shape_cast %119 : vector<2x1x32xf32> to vector<2x32xf32>
    %121 = vector.shape_cast %118 : vector<2x32xf32> to vector<2x1x32xf32>
    tpu.vector_store %arg10[%c0_31, %c4, %c0_32], %121 {strides = array<i32>} : memref<2x8x32xf32, #tpu.memory_space<vmem>>, vector<2x1x32xf32>,
    %122 = vector.extract_strided_slice %9 {offsets = [10, 0], sizes = [2, 128], strides = [1, 1]} : vector<16x128xf32> to vector<2x128xf32>
    %cst_33 = arith.constant dense<0.000000e+00> : vector<2x128xf32>
    %123 = tpu.matmul %118, %4, %cst_33 {dimension_numbers = #tpu.dot_dimension_numbers<[1], [0], [0], [1], [0, 0, 1, 1], [], []>} : vector<2x32xf32>, vector<32x128xf32>, vector<2x128xf32> -> vector<2x128xf32>
    %124 = arith.addf %122, %123 : vector<2x128xf32>
    %125 = vector.extract_strided_slice %124 {offsets = [0, 0], sizes = [2, 96], strides = [1, 1]} : vector<2x128xf32> to vector<2x96xf32>
    %126 = arith.negf %125 : vector<2x96xf32>
    %127 = math.exp %126 : vector<2x96xf32>
    %cst_34 = arith.constant 1.000000e+00 : f32
    %128 = vector.broadcast %cst_34 : f32 to vector<2x96xf32>
    %129 = arith.addf %128, %127 : vector<2x96xf32>
    %130 = arith.divf %128, %129 : vector<2x96xf32>
    %131 = vector.extract_strided_slice %124 {offsets = [0, 96], sizes = [2, 32], strides = [1, 1]} : vector<2x128xf32> to vector<2x32xf32>
    %132 = math.tanh %131 : vector<2x32xf32>
    %133 = vector.extract_strided_slice %130 {offsets = [0, 32], sizes = [2, 32], strides = [1, 1]} : vector<2x96xf32> to vector<2x32xf32>
    %134 = arith.mulf %133, %115 : vector<2x32xf32>
    %135 = vector.extract_strided_slice %130 {offsets = [0, 0], sizes = [2, 32], strides = [1, 1]} : vector<2x96xf32> to vector<2x32xf32>
    %136 = arith.mulf %135, %132 : vector<2x32xf32>
    %137 = arith.addf %134, %136 : vector<2x32xf32>
    %138 = vector.extract_strided_slice %130 {offsets = [0, 64], sizes = [2, 32], strides = [1, 1]} : vector<2x96xf32> to vector<2x32xf32>
    %139 = math.tanh %137 : vector<2x32xf32>
    %140 = arith.mulf %138, %139 : vector<2x32xf32>
    %c0_35 = arith.constant 0 : index
    %c5 = arith.constant 5 : index
    %c0_36 = arith.constant 0 : index
    %141 = vector.load %arg10[%c0_35, %c5, %c0_36] : memref<2x8x32xf32, #tpu.memory_space<vmem>>, vector<2x1x32xf32>
    %142 = vector.shape_cast %141 : vector<2x1x32xf32> to vector<2x32xf32>
    %143 = vector.shape_cast %140 : vector<2x32xf32> to vector<2x1x32xf32>
    tpu.vector_store %arg10[%c0_35, %c5, %c0_36], %143 {strides = array<i32>} : memref<2x8x32xf32, #tpu.memory_space<vmem>>, vector<2x1x32xf32>,
    %144 = vector.extract_strided_slice %9 {offsets = [12, 0], sizes = [2, 128], strides = [1, 1]} : vector<16x128xf32> to vector<2x128xf32>
    %cst_37 = arith.constant dense<0.000000e+00> : vector<2x128xf32>
    %145 = tpu.matmul %140, %4, %cst_37 {dimension_numbers = #tpu.dot_dimension_numbers<[1], [0], [0], [1], [0, 0, 1, 1], [], []>} : vector<2x32xf32>, vector<32x128xf32>, vector<2x128xf32> -> vector<2x128xf32>
    %146 = arith.addf %144, %145 : vector<2x128xf32>
    %147 = vector.extract_strided_slice %146 {offsets = [0, 0], sizes = [2, 96], strides = [1, 1]} : vector<2x128xf32> to vector<2x96xf32>
    %148 = arith.negf %147 : vector<2x96xf32>
    %149 = math.exp %148 : vector<2x96xf32>
    %cst_38 = arith.constant 1.000000e+00 : f32
    %150 = vector.broadcast %cst_38 : f32 to vector<2x96xf32>
    %151 = arith.addf %150, %149 : vector<2x96xf32>
    %152 = arith.divf %150, %151 : vector<2x96xf32>
    %153 = vector.extract_strided_slice %146 {offsets = [0, 96], sizes = [2, 32], strides = [1, 1]} : vector<2x128xf32> to vector<2x32xf32>
    %154 = math.tanh %153 : vector<2x32xf32>
    %155 = vector.extract_strided_slice %152 {offsets = [0, 32], sizes = [2, 32], strides = [1, 1]} : vector<2x96xf32> to vector<2x32xf32>
    %156 = arith.mulf %155, %137 : vector<2x32xf32>
    %157 = vector.extract_strided_slice %152 {offsets = [0, 0], sizes = [2, 32], strides = [1, 1]} : vector<2x96xf32> to vector<2x32xf32>
    %158 = arith.mulf %157, %154 : vector<2x32xf32>
    %159 = arith.addf %156, %158 : vector<2x32xf32>
    %160 = vector.extract_strided_slice %152 {offsets = [0, 64], sizes = [2, 32], strides = [1, 1]} : vector<2x96xf32> to vector<2x32xf32>
    %161 = math.tanh %159 : vector<2x32xf32>
    %162 = arith.mulf %160, %161 : vector<2x32xf32>
    %c0_39 = arith.constant 0 : index
    %c6 = arith.constant 6 : index
    %c0_40 = arith.constant 0 : index
    %163 = vector.load %arg10[%c0_39, %c6, %c0_40] : memref<2x8x32xf32, #tpu.memory_space<vmem>>, vector<2x1x32xf32>
    %164 = vector.shape_cast %163 : vector<2x1x32xf32> to vector<2x32xf32>
    %165 = vector.shape_cast %162 : vector<2x32xf32> to vector<2x1x32xf32>
    tpu.vector_store %arg10[%c0_39, %c6, %c0_40], %165 {strides = array<i32>} : memref<2x8x32xf32, #tpu.memory_space<vmem>>, vector<2x1x32xf32>,
    %166 = vector.extract_strided_slice %9 {offsets = [14, 0], sizes = [2, 128], strides = [1, 1]} : vector<16x128xf32> to vector<2x128xf32>
    %cst_41 = arith.constant dense<0.000000e+00> : vector<2x128xf32>
    %167 = tpu.matmul %162, %4, %cst_41 {dimension_numbers = #tpu.dot_dimension_numbers<[1], [0], [0], [1], [0, 0, 1, 1], [], []>} : vector<2x32xf32>, vector<32x128xf32>, vector<2x128xf32> -> vector<2x128xf32>
    %168 = arith.addf %166, %167 : vector<2x128xf32>
    %169 = vector.extract_strided_slice %168 {offsets = [0, 0], sizes = [2, 96], strides = [1, 1]} : vector<2x128xf32> to vector<2x96xf32>
    %170 = arith.negf %169 : vector<2x96xf32>
    %171 = math.exp %170 : vector<2x96xf32>
    %cst_42 = arith.constant 1.000000e+00 : f32
    %172 = vector.broadcast %cst_42 : f32 to vector<2x96xf32>
    %173 = arith.addf %172, %171 : vector<2x96xf32>
    %174 = arith.divf %172, %173 : vector<2x96xf32>
    %175 = vector.extract_strided_slice %168 {offsets = [0, 96], sizes = [2, 32], strides = [1, 1]} : vector<2x128xf32> to vector<2x32xf32>
    %176 = math.tanh %175 : vector<2x32xf32>
    %177 = vector.extract_strided_slice %174 {offsets = [0, 32], sizes = [2, 32], strides = [1, 1]} : vector<2x96xf32> to vector<2x32xf32>
    %178 = arith.mulf %177, %159 : vector<2x32xf32>
    %179 = vector.extract_strided_slice %174 {offsets = [0, 0], sizes = [2, 32], strides = [1, 1]} : vector<2x96xf32> to vector<2x32xf32>
    %180 = arith.mulf %179, %176 : vector<2x32xf32>
    %181 = arith.addf %178, %180 : vector<2x32xf32>
    %182 = vector.extract_strided_slice %174 {offsets = [0, 64], sizes = [2, 32], strides = [1, 1]} : vector<2x96xf32> to vector<2x32xf32>
    %183 = math.tanh %181 : vector<2x32xf32>
    %184 = arith.mulf %182, %183 : vector<2x32xf32>
    %c0_43 = arith.constant 0 : index
    %c7 = arith.constant 7 : index
    %c0_44 = arith.constant 0 : index
    %185 = vector.load %arg10[%c0_43, %c7, %c0_44] : memref<2x8x32xf32, #tpu.memory_space<vmem>>, vector<2x1x32xf32>
    %186 = vector.shape_cast %185 : vector<2x1x32xf32> to vector<2x32xf32>
    %187 = vector.shape_cast %184 : vector<2x32xf32> to vector<2x1x32xf32>
    tpu.vector_store %arg10[%c0_43, %c7, %c0_44], %187 {strides = array<i32>} : memref<2x8x32xf32, #tpu.memory_space<vmem>>, vector<2x1x32xf32>,
    %c0_45 = arith.constant 0 : index
    %c0_46 = arith.constant 0 : index
    %c0_47 = arith.constant 0 : index
    %188 = vector.load %arg10[%c0_45, %c0_46, %c0_47] : memref<2x8x32xf32, #tpu.memory_space<vmem>>, vector<2x8x32xf32>
    %c0_48 = arith.constant 0 : index
    %c0_49 = arith.constant 0 : index
    %189 = vector.load %arg4[%c0_48, %c0_49] : memref<32x17xf32, #tpu.memory_space<vmem>>, vector<32x17xf32>
    %190 = vector.extract_strided_slice %189 {offsets = [0, 16], sizes = [32, 1], strides = [1, 1]} : vector<32x17xf32> to vector<32x1xf32>
    %191 = vector.shape_cast %190 : vector<32x1xf32> to vector<32xf32>
    %192 = vector.shape_cast %191 : vector<32xf32> to vector<1x1x32xf32>
    %193 = vector.broadcast %192 : vector<1x1x32xf32> to vector<2x8x32xf32>
    %194 = arith.mulf %188, %193 : vector<2x8x32xf32>
    %cst_50 = arith.constant dense<0.000000e+00> : vector<2x8xf32>
    %195 = vector.multi_reduction <add>, %194, %cst_50 [2] : vector<2x8x32xf32> to vector<2x8xf32>
    %cst_51 = arith.constant dense<0xFF800000> : vector<2xf32>
    %196 = vector.multi_reduction <maximumf>, %195, %cst_51 [1] : vector<2x8xf32> to vector<2xf32>
    %197 = vector.shape_cast %196 : vector<2xf32> to vector<2x1xf32>
    %198 = vector.broadcast %197 : vector<2x1xf32> to vector<2x8xf32>
    %199 = arith.subf %195, %198 : vector<2x8xf32>
    %200 = math.exp %199 : vector<2x8xf32>
    %cst_52 = arith.constant dense<0.000000e+00> : vector<2xf32>
    %201 = vector.multi_reduction <add>, %200, %cst_52 [1] : vector<2x8xf32> to vector<2xf32>
    %202 = vector.shape_cast %201 : vector<2xf32> to vector<2x1xf32>
    %203 = vector.broadcast %202 : vector<2x1xf32> to vector<2x8xf32>
    %204 = arith.divf %200, %203 : vector<2x8xf32>
    %205 = vector.shape_cast %204 : vector<2x8xf32> to vector<2x8x1xf32>
    %206 = vector.broadcast %205 : vector<2x8x1xf32> to vector<2x8x32xf32>
    %207 = arith.mulf %206, %188 : vector<2x8x32xf32>
    %cst_53 = arith.constant dense<0.000000e+00> : vector<2x32xf32>
    %208 = vector.multi_reduction <add>, %207, %cst_53 [1] : vector<2x8x32xf32> to vector<2x32xf32>
    %209 = vector.extract_strided_slice %189 {offsets = [0, 0], sizes = [32, 16], strides = [1, 1]} : vector<32x17xf32> to vector<32x16xf32>
    %cst_54 = arith.constant dense<0.000000e+00> : vector<2x16xf32>
    %210 = tpu.matmul %208, %209, %cst_54 {dimension_numbers = #tpu.dot_dimension_numbers<[1], [0], [0], [1], [0, 0, 1, 1], [], []>} : vector<2x32xf32>, vector<32x16xf32>, vector<2x16xf32> -> vector<2x16xf32>
    %c0_55 = arith.constant 0 : index
    %c0_56 = arith.constant 0 : index
    %211 = vector.load %arg5[%c0_55, %c0_56] : memref<1x16xf32, #tpu.memory_space<vmem>>, vector<1x16xf32>
    %212 = vector.broadcast %211 : vector<1x16xf32> to vector<2x16xf32>
    %213 = arith.addf %210, %212 : vector<2x16xf32>
    %cst_57 = arith.constant 0.000000e+00 : f32
    %214 = vector.broadcast %cst_57 : f32 to vector<2x16xf32>
    %215 = arith.maximumf %213, %214 : vector<2x16xf32>
    %c0_58 = arith.constant 0 : index
    %c0_59 = arith.constant 0 : index
    %216 = vector.load %arg6[%c0_58, %c0_59] : memref<16x9xf32, #tpu.memory_space<vmem>>, vector<16x9xf32>
    %cst_60 = arith.constant dense<0.000000e+00> : vector<2x9xf32>
    %217 = tpu.matmul %215, %216, %cst_60 {dimension_numbers = #tpu.dot_dimension_numbers<[1], [0], [0], [1], [0, 0, 1, 1], [], []>} : vector<2x16xf32>, vector<16x9xf32>, vector<2x9xf32> -> vector<2x9xf32>
    %c0_61 = arith.constant 0 : index
    %c0_62 = arith.constant 0 : index
    %218 = vector.load %arg7[%c0_61, %c0_62] : memref<1x9xf32, #tpu.memory_space<vmem>>, vector<1x9xf32>
    %219 = vector.broadcast %218 : vector<1x9xf32> to vector<2x9xf32>
    %220 = arith.addf %217, %219 : vector<2x9xf32>
    %221 = vector.extract_strided_slice %220 {offsets = [0, 0], sizes = [2, 3], strides = [1, 1]} : vector<2x9xf32> to vector<2x3xf32>
    %cst_63 = arith.constant dense<0xFF800000> : vector<2xf32>
    %222 = vector.multi_reduction <maximumf>, %221, %cst_63 [1] : vector<2x3xf32> to vector<2xf32>
    %223 = vector.shape_cast %222 : vector<2xf32> to vector<2x1xf32>
    %224 = vector.broadcast %223 : vector<2x1xf32> to vector<2x3xf32>
    %225 = arith.subf %221, %224 : vector<2x3xf32>
    %226 = math.exp %225 : vector<2x3xf32>
    %cst_64 = arith.constant dense<0.000000e+00> : vector<2xf32>
    %227 = vector.multi_reduction <add>, %226, %cst_64 [1] : vector<2x3xf32> to vector<2xf32>
    %228 = vector.shape_cast %227 : vector<2xf32> to vector<2x1xf32>
    %229 = vector.broadcast %228 : vector<2x1xf32> to vector<2x3xf32>
    %230 = arith.divf %226, %229 : vector<2x3xf32>
    %231 = vector.extract_strided_slice %220 {offsets = [0, 3], sizes = [2, 3], strides = [1, 1]} : vector<2x9xf32> to vector<2x3xf32>
    %232 = vector.extract_strided_slice %220 {offsets = [0, 6], sizes = [2, 3], strides = [1, 1]} : vector<2x9xf32> to vector<2x3xf32>
    %233 = math.exp %232 : vector<2x3xf32>
    %cst_65 = arith.constant 1.000000e-03 : f32
    %cst_66 = arith.constant 1.000000e+03 : f32
    %234 = vector.broadcast %cst_65 : f32 to vector<2x3xf32>
    %235 = arith.maximumf %234, %233 : vector<2x3xf32>
    %236 = vector.broadcast %cst_66 : f32 to vector<2x3xf32>
    %237 = arith.minimumf %236, %235 : vector<2x3xf32>
    %238 = tpu.concatenate %230, %231, %237 in 1 : vector<2x3xf32>, vector<2x3xf32>, vector<2x3xf32> -> vector<2x9xf32>
    %c0_67 = arith.constant 0 : index
    %c0_68 = arith.constant 0 : index
    %239 = vector.load %arg8[%c0_67, %c0_68] : memref<2x9xf32, #tpu.memory_space<vmem>>, vector<2x9xf32>
    tpu.vector_store %arg8[%c0_67, %c0_68], %238 {strides = array<i32>} : memref<2x9xf32, #tpu.memory_space<vmem>>, vector<2x9xf32>,
    %c0_69 = arith.constant 0 : index
    %c0_70 = arith.constant 0 : index
    %240 = vector.load %arg9[%c0_69, %c0_70] : memref<2x8xf32, #tpu.memory_space<vmem>>, vector<2x8xf32>
    tpu.vector_store %arg9[%c0_69, %c0_70], %204 {strides = array<i32>} : memref<2x8xf32, #tpu.memory_space<vmem>>, vector<2x8xf32>,
    return
  }
}

</mosaic_0001>

<bundles_post_ra>
// kernel: var_model_forward.1
= control target key start
LH: loop header
LB: loop body
LE: loop exit
PB: predicated region body
PF: predicated region fallthrough
CT: control target
= control target key end

     0   :  { %vm43_vm0 = vcmask 64512   ;;  %s1413_s0 = inlined_call_operand.vmem [shape: f32[16,8], index: 0, kind: input, shape index: {}]   ;;  %s1414_s1 = inlined_call_operand.vmem [shape: f32[1,8,128], index: 1, kind: input, shape index: {}]   ;;  %s1415_s2 = inlined_call_operand.vmem [shape: f32[1,32,128], index: 2, kind: input, shape index: {}]   ;;  %s1416_s3 = inlined_call_operand.vmem [shape: f32[1,1,128], index: 3, kind: input, shape index: {}]   ;;  %s1417_s4 = inlined_call_operand.vmem [shape: f32[32,17], index: 4, kind: input, shape index: {}]   ;;  %s1418_s5 = inlined_call_operand.vmem [shape: f32[1,16], index: 5, kind: input, shape index: {}]   ;;  %s1419_s6 = inlined_call_operand.vmem [shape: f32[16,9], index: 6, kind: input, shape index: {}]   ;;  %s1420_s7 = inlined_call_operand.vmem [shape: f32[1,9], index: 7, kind: input, shape index: {}]   ;;  %s1421_s8 = inlined_call_operand.vmem [shape: f32[2,9], index: 8, kind: output, shape index: {0}]   ;;  %s1422_s9 = inlined_call_operand.hbm [shape: f32[2,8], index: 9, kind: output, shape index: {1}]  }
   0x1   :  { %v38_v0 = vld [vmem:[%s1415_s2 + $0x18] sm:$0xff]  ;;  %v37_v1 = vld [vmem:[%s1415_s2 + $0x10] sm:$0xff]  ;;  %v34_v2 = vld [vmem:[%s1414_s1] sm:$0xff] }
   0x2   :  { %89 = vmatpush.msra.mxu1 %v38_v0  ;;  %65 = vmatpush.msra.mxu0 %v34_v2  ;;  %v32_v3 = vld [vmem:[%s1413_s0] sm:$0xff]  ;;  %v36_v4 = vld [vmem:[%s1415_s2 + $0x8] sm:$0xff] }
   0x3   :  { %1010 = vmatmul.msk.f32.vlgmr.msra.gmra.mxu0 %vm43_vm0, %v32_v3  ;;  %164 = vmatpush.msra.mxu2 %v38_v0 }
   0x4   :  { %90 = vmatpush.msra.mxu1 %v37_v1  ;;  %249 = vmatpush.msra.mxu3 %v38_v0 }
   0x5   :  { %15 = vsyncpa [#allocation4], 0  ;;  %v35_v5 = vld [vmem:[%s1415_s2] sm:$0xff]  ;;  %165 = vmatpush.msra.mxu2 %v37_v1  ;;  %581 = vmatpush.msrb.mxu0 %v38_v0  ;;  %v1148_v6 = vmov 0.0   ;;  %s1149_s21 = smov 32   ;;  %vm73_vm5 = vcmask 261120  }
   0x6   :  { %91 = vmatpush.msra.mxu1 %v36_v4  ;;  %250 = vmatpush.msra.mxu3 %v37_v1  ;;  %v1226_v7 = vld [vmem:[%s1416_s3] ss:$0 sm:$0xff]  ;;  %s1150_s3 = smov 64   ;;  %s999_s19 = sshll.u32 %s1422_s9, 4  ;;  %s1000_s19 = int_to_ptr.hbm [resolvable:$true] %s999_s19 }
   0x7   :  { %166 = vmatpush.msra.mxu2 %v36_v4  ;;  %582 = vmatpush.msrb.mxu0 %v37_v1 }
   0x8   :  { %92 = vmatpush.msra.mxu1 %v35_v5  ;;  %251 = vmatpush.msra.mxu3 %v36_v4 }
   0x9   :  { %93 = vmatmul.f32.vlgmr.msra.gmra.mxu1 %v1148_v6  ;;  %167 = vmatpush.msra.mxu2 %v35_v5 }
   0xa   :  { %252 = vmatpush.msra.mxu3 %v35_v5  ;;  %334 = vmatpush.msrb.mxu1 %v38_v0 }
   0xb   :  { %419 = vmatpush.msrb.mxu2 %v38_v0  ;;  %583 = vmatpush.msrb.mxu0 %v36_v4 }
   0xc   :  { %496 = vmatpush.msrb.mxu3 %v38_v0  ;;  %335 = vmatpush.msrb.mxu1 %v37_v1 }
   0xd   :  { %420 = vmatpush.msrb.mxu2 %v37_v1  ;;  %584 = vmatpush.msrb.mxu0 %v35_v5 }
   0xe   :  { %497 = vmatpush.msrb.mxu3 %v37_v1  ;;  %336 = vmatpush.msrb.mxu1 %v36_v4 }
   0xf   :  { %421 = vmatpush.msrb.mxu2 %v36_v4 }
  0x10   :  { %498 = vmatpush.msrb.mxu3 %v36_v4  ;;  %337 = vmatpush.msrb.mxu1 %v35_v5 }
  0x11   :  { %422 = vmatpush.msrb.mxu2 %v35_v5 }
  0x12   :  { %499 = vmatpush.msrb.mxu3 %v35_v5  ;;  %666 = vmatpush.msra.mxu1 %v38_v0 }
  0x14   :  { %667 = vmatpush.msra.mxu1 %v37_v1 }
  0x16   :  { %668 = vmatpush.msra.mxu1 %v36_v4 }
  0x18   :  { %669 = vmatpush.msra.mxu1 %v35_v5 }
  0x80   :  { %v67_v8 = vpop.f32.mrf.mxu0 }
  0x81   :  { %v1229_v9 = vadd.f32 %v1226_v7, %v67_v8 }
  0x86   :  { %v94_v10 = vpop.f32.mrf.mxu1 }
  0x87   :  { %v97_v11 = vadd.f32 %v94_v10, %v1229_v9 }
  0x89   :  { %1044 = vtanh.f32 %v97_v11  ;;  %v1012_v13 = vmul.f32 -1.442695, %v97_v11 }
  0x8b   :  { %1046 = vpow2.f32 %v1012_v13 }
  0x8f   :  { %v1045_v12 = vpop.eup %1044 }
  0x90   :  { %120 = vrot.lane.b32.xlu0 %v1045_v12, %s1149_s21 }
  0x91   :  { %v1047_v14 = vpop.eup %1046 }
  0x92   :  { %v101_v15 = vadd.f32 1.0, %v1047_v14 }
  0x94   :  { %1048 = vrcp.f32 %v101_v15  ;;  %v113_v21 = vand.u32 2147483648, %v101_v15  ;;  %vm107_vm2 = vweird.f32 %v101_v15  ;;  %v111_v22 = vand.u32 2147483647, %v101_v15 }
  0x96   :  { %v114_v24 = vor.u32 1.1754944e-38, %v113_v21  ;;  %vm112_vm4 = vcmp.eq.f32.partialorder %v111_v22, 8.507059e+37 }
  0x9a   :  { %v1049_v16 = vpop.eup %1048 }
  0x9b   :  { %v103_v17 = vmul.f32 %v1049_v16, %v101_v15  ;;  %vm108_vm1 = vweird.f32 %v1049_v16 }
  0x9c   :  { %vm109_vm3 = vmor %vm107_vm2, %vm108_vm1 }
  0x9d   :  { %v104_v18 = vsub.f32 1.0, %v103_v17 }
  0x9f   :  { %v105_v19 = vmul.f32 %v1049_v16, %v104_v18 }
  0xa1   :  { %v106_v20 = vadd.f32 %v1049_v16, %v105_v19 }
  0xa3   :  { %v110_v23 = vsel %vm109_vm3, %v1049_v16, %v106_v20 }
  0xa4   :  { %v115_v26 = vsel %vm112_vm4, %v114_v24, %v110_v23 }
  0xa5   :  { %v118_v28 = vmul.f32 0.0, %v115_v26 }
 0x102   :  { %v121_v25 = vpop.permute.xlu0 %120 }
 0x103   :  { %v123_v27 = vmul.f32 %v121_v25, %v115_v26 }
 0x105   :  { %125 = vrot.lane.b32.xlu0 %v123_v27, %s1149_s21 }
 0x177   :  { %v126_v29 = vpop.permute.xlu0 %125 }
 0x178   :  { %v128_v30 = vadd.f32 %v126_v29, %v118_v28 }
 0x17a   :  { %1050 = vtanh.f32 %v128_v30  ;;  %v197_v54 = vrot.slane %v128_v30, 6 }
 0x180   :  { %v1051_v31 = vpop.eup %1050 }
 0x181   :  { %131 = vrot.lane.b32.xlu1 %v1051_v31, %s1149_s21 }
 0x1f3   :  { %v132_v32 = vpop.permute.xlu1 %131 }
 0x1f4   :  { %v1235_v33 = vmul.f32 %v132_v32, %v115_v26 }
 0x1f6   :  { %148 = vrot.lane.b32.xlu1 %v1235_v33, %s1150_s3 }
 0x268   :  { %v149_v34 = vpop.permute.xlu1 %148 }
 0x269   :  { %1013 = vmatmul.msk.f32.vlgmr.msra.gmra.mxu2 %vm73_vm5, %v149_v34 }
 0x2ec   :  { %v169_v35 = vpop.f32.mrf.mxu2 }
 0x2ed   :  { %v173_v36 = vrot.slane %v169_v35, 6 }
 0x2ef   :  { %v175_v37 = vadd.f32 %v173_v36, %v1229_v9 }
 0x2f1   :  { %1052 = vtanh.f32 %v175_v37  ;;  %v1014_v39 = vmul.f32 -1.442695, %v175_v37 }
 0x2f3   :  { %1054 = vpow2.f32 %v1014_v39 }
 0x2f7   :  { %v1053_v38 = vpop.eup %1052 }
 0x2f8   :  { %201 = vrot.lane.b32.xlu2 %v1053_v38, %s1149_s21 }
 0x2f9   :  { %v1055_v40 = vpop.eup %1054 }
 0x2fa   :  { %v179_v41 = vadd.f32 1.0, %v1055_v40 }
 0x2fc   :  { %1056 = vrcp.f32 %v179_v41  ;;  %v191_v47 = vand.u32 2147483648, %v179_v41  ;;  %vm185_vm7 = vweird.f32 %v179_v41  ;;  %v189_v48 = vand.u32 2147483647, %v179_v41 }
 0x2fe   :  { %v192_v50 = vor.u32 1.1754944e-38, %v191_v47  ;;  %vm190_vm9 = vcmp.eq.f32.partialorder %v189_v48, 8.507059e+37 }
 0x302   :  { %v1057_v42 = vpop.eup %1056 }
 0x303   :  { %v181_v43 = vmul.f32 %v1057_v42, %v179_v41  ;;  %vm186_vm6 = vweird.f32 %v1057_v42 }
 0x304   :  { %vm187_vm8 = vmor %vm185_vm7, %vm186_vm6 }
 0x305   :  { %v182_v44 = vsub.f32 1.0, %v181_v43 }
 0x307   :  { %v183_v45 = vmul.f32 %v1057_v42, %v182_v44 }
 0x309   :  { %v184_v46 = vadd.f32 %v1057_v42, %v183_v45 }
 0x30b   :  { %v188_v49 = vsel %vm187_vm8, %v1057_v42, %v184_v46 }
 0x30c   :  { %v193_v52 = vsel %vm190_vm9, %v192_v50, %v188_v49 }
 0x30d   :  { %v199_v55 = vmul.f32 %v197_v54, %v193_v52 }
 0x352   :  { %v202_v51 = vpop.permute.xlu2 %201 }
 0x353   :  { %v204_v53 = vmul.f32 %v202_v51, %v193_v52 }
 0x355   :  { %206 = vrot.lane.b32.xlu2 %v204_v53, %s1149_s21 }
 0x3af   :  { %v207_v56 = vpop.permute.xlu2 %206 }
 0x3b0   :  { %v209_v57 = vadd.f32 %v207_v56, %v199_v55 }
 0x3b2   :  { %1058 = vtanh.f32 %v209_v57  ;;  %v282_v20 = vrot.slane %v209_v57, 6 }
 0x3b8   :  { %v1059_v58 = vpop.eup %1058 }
 0x3b9   :  { %212 = vrot.lane.b32.xlu0 %v1059_v58, %s1149_s21 }
 0x42b   :  { %v213_v59 = vpop.permute.xlu0 %212 }
 0x42c   :  { %v215_v60 = vmul.f32 %v213_v59, %v193_v52 }
 0x42e   :  { %217 = vst [vmem:[#allocation1] sm:$0xff] %v215_v60  ;;  %v232_v61 = vrot.slane %v215_v60, 2  ;;  %v33_v60 = vld [vmem:[%s1413_s0 + $0x8] sm:$0xff] }
 0x42f   :  { %1011 = vmatmul.msk.f32.gmra.mxu0 %vm43_vm0, %v33_v60 }
 0x430   :  { %233 = vrot.lane.b32.xlu1 %v232_v61, %s1150_s3 }
 0x435   :  { %v1250_v27 = vld [vmem:[#allocation1 + $0x2] ss:$9 sm:$0xff] }
 0x436   :  { %v1252_v28 = vld [vmem:[#allocation1 + $0x3] ss:$9 sm:$0xff] }
 0x4a2   :  { %v234_v62 = vpop.permute.xlu1 %233 }
 0x4a3   :  { %1015 = vmatmul.msk.f32.vlgmr.msra.gmra.mxu3 %vm73_vm5, %v234_v62 }
 0x4ac   :  { %v70_v62 = vpop.f32.mrf.mxu0 }
 0x526   :  { %v254_v63 = vpop.f32.mrf.mxu3 }
 0x527   :  { %v258_v0 = vrot.slane %v254_v63, 4  ;;  %v1271_v63 = vadd.f32 %v1226_v7, %v70_v62 }
 0x529   :  { %v260_v1 = vadd.f32 %v258_v0, %v1229_v9 }
 0x52b   :  { %1060 = vtanh.f32 %v260_v1  ;;  %v1016_v3 = vmul.f32 -1.442695, %v260_v1 }
 0x52d   :  { %1062 = vpow2.f32 %v1016_v3 }
 0x531   :  { %v1061_v2 = vpop.eup %1060 }
 0x532   :  { %286 = vrot.lane.b32.xlu2 %v1061_v2, %s1149_s21 }
 0x533   :  { %v1063_v4 = vpop.eup %1062 }
 0x534   :  { %v264_v5 = vadd.f32 1.0, %v1063_v4 }
 0x536   :  { %1064 = vrcp.f32 %v264_v5  ;;  %v276_v13 = vand.u32 2147483648, %v264_v5  ;;  %vm270_vm11 = vweird.f32 %v264_v5  ;;  %v274_v14 = vand.u32 2147483647, %v264_v5 }
 0x538   :  { %v277_v16 = vor.u32 1.1754944e-38, %v276_v13  ;;  %vm275_vm13 = vcmp.eq.f32.partialorder %v274_v14, 8.507059e+37 }
 0x53c   :  { %v1065_v6 = vpop.eup %1064 }
 0x53d   :  { %v266_v8 = vmul.f32 %v1065_v6, %v264_v5  ;;  %vm271_vm10 = vweird.f32 %v1065_v6 }
 0x53e   :  { %vm272_vm12 = vmor %vm270_vm11, %vm271_vm10 }
 0x53f   :  { %v267_v10 = vsub.f32 1.0, %v266_v8 }
 0x541   :  { %v268_v11 = vmul.f32 %v1065_v6, %v267_v10 }
 0x543   :  { %v269_v12 = vadd.f32 %v1065_v6, %v268_v11 }
 0x545   :  { %v273_v15 = vsel %vm272_vm12, %v1065_v6, %v269_v12 }
 0x546   :  { %v278_v18 = vsel %vm275_vm13, %v277_v16, %v273_v15 }
 0x547   :  { %v284_v21 = vmul.f32 %v282_v20, %v278_v18 }
 0x58c   :  { %v287_v17 = vpop.permute.xlu2 %286 }
 0x58d   :  { %v289_v19 = vmul.f32 %v287_v17, %v278_v18 }
 0x58f   :  { %291 = vrot.lane.b32.xlu0 %v289_v19, %s1149_s21 }
 0x601   :  { %v292_v22 = vpop.permute.xlu0 %291 }
 0x602   :  { %v294_v23 = vadd.f32 %v292_v22, %v284_v21 }
 0x604   :  { %1066 = vtanh.f32 %v294_v23  ;;  %v367_v50 = vrot.slane %v294_v23, 6 }
 0x60a   :  { %v1067_v24 = vpop.eup %1066 }
 0x60b   :  { %297 = vrot.lane.b32.xlu1 %v1067_v24, %s1149_s21 }
 0x67d   :  { %v298_v25 = vpop.permute.xlu1 %297 }
 0x67e   :  { %v300_v26 = vmul.f32 %v298_v25, %v278_v18 }
 0x680   :  { %302 = vst [vmem:[#allocation1] sm:$0xff] %v300_v26  ;;  %v317_v29 = vrot.slane %v300_v26, 4 }
 0x682   :  { %318 = vrot.lane.b32.xlu2 %v317_v29, %s1150_s3 }
 0x687   :  { %v1260_v57 = vld [vmem:[#allocation1 + $0x4] ss:$9 sm:$0xff] }
 0x688   :  { %v1262_v58 = vld [vmem:[#allocation1 + $0x5] ss:$9 sm:$0xff] }
 0x6dc   :  { %v319_v30 = vpop.permute.xlu2 %318 }
 0x6dd   :  { %1017 = vmatmul.msk.f32.vlgmr.msrb.gmra.mxu1 %vm73_vm5, %v319_v30 }
 0x75a   :  { %v339_v31 = vpop.f32.mrf.mxu1 }
 0x75b   :  { %v343_v32 = vrot.slane %v339_v31, 2 }
 0x75d   :  { %v345_v34 = vadd.f32 %v343_v32, %v1229_v9 }
 0x75f   :  { %1068 = vtanh.f32 %v345_v34  ;;  %v1018_v36 = vmul.f32 -1.442695, %v345_v34 }
 0x761   :  { %1070 = vpow2.f32 %v1018_v36 }
 0x765   :  { %v1069_v35 = vpop.eup %1068 }
 0x766   :  { %371 = vrot.lane.b32.xlu0 %v1069_v35, %s1149_s21 }
 0x767   :  { %v1071_v37 = vpop.eup %1070 }
 0x768   :  { %v349_v38 = vadd.f32 1.0, %v1071_v37 }
 0x76a   :  { %1072 = vrcp.f32 %v349_v38  ;;  %v361_v44 = vand.u32 2147483648, %v349_v38  ;;  %vm355_vm15 = vweird.f32 %v349_v38  ;;  %v359_v45 = vand.u32 2147483647, %v349_v38 }
 0x76c   :  { %v362_v46 = vor.u32 1.1754944e-38, %v361_v44  ;;  %vm360_vm2 = vcmp.eq.f32.partialorder %v359_v45, 8.507059e+37 }
 0x770   :  { %v1073_v39 = vpop.eup %1072 }
 0x771   :  { %v351_v40 = vmul.f32 %v1073_v39, %v349_v38  ;;  %vm356_vm14 = vweird.f32 %v1073_v39 }
 0x772   :  { %vm357_vm1 = vmor %vm355_vm15, %vm356_vm14 }
 0x773   :  { %v352_v41 = vsub.f32 1.0, %v351_v40 }
 0x775   :  { %v353_v42 = vmul.f32 %v1073_v39, %v352_v41 }
 0x777   :  { %v354_v43 = vadd.f32 %v1073_v39, %v353_v42 }
 0x779   :  { %v358_v9 = vsel %vm357_vm1, %v1073_v39, %v354_v43 }
 0x77a   :  { %v363_v48 = vsel %vm360_vm2, %v362_v46, %v358_v9 }
 0x77b   :  { %v369_v51 = vmul.f32 %v367_v50, %v363_v48 }
 0x7d8   :  { %v372_v47 = vpop.permute.xlu0 %371 }
 0x7d9   :  { %v374_v49 = vmul.f32 %v372_v47, %v363_v48 }
 0x7db   :  { %376 = vrot.lane.b32.xlu1 %v374_v49, %s1149_s21 }
 0x84d   :  { %v377_v52 = vpop.permute.xlu1 %376 }
 0x84e   :  { %v379_v53 = vadd.f32 %v377_v52, %v369_v51 }
 0x850   :  { %1074 = vtanh.f32 %v379_v53  ;;  %v449_v19 = vrot.slane %v379_v53, 6 }
 0x856   :  { %v1075_v54 = vpop.eup %1074 }
 0x857   :  { %382 = vrot.lane.b32.xlu2 %v1075_v54, %s1149_s21 }
 0x8b1   :  { %v383_v55 = vpop.permute.xlu2 %382 }
 0x8b2   :  { %v385_v56 = vmul.f32 %v383_v55, %v363_v48 }
 0x8b4   :  { %387 = vst [vmem:[#allocation1] sm:$0xff] %v385_v56  ;;  %v402_v59 = vrot.slane %v385_v56, 6 }
 0x8b6   :  { %403 = vrot.lane.b32.xlu0 %v402_v59, %s1150_s3 }
 0x8bb   :  { %v389_v55 = vld [vmem:[#allocation1 + $0x6] ss:$9 sm:$0xff] }
 0x8bc   :  { %v1286_v56 = vld [vmem:[#allocation1 + $0x7] ss:$9 sm:$0xff] }
 0x928   :  { %v404_v61 = vpop.permute.xlu0 %403 }
 0x929   :  { %1019 = vmatmul.msk.f32.vlgmr.msrb.gmra.mxu2 %vm73_vm5, %v404_v61 }
 0x9ac   :  { %v424_v0 = vpop.f32.mrf.mxu2 }
 0x9ad   :  { %v427_v1 = vadd.f32 %v424_v0, %v1271_v63 }
 0x9af   :  { %1076 = vtanh.f32 %v427_v1  ;;  %v1020_v3 = vmul.f32 -1.442695, %v427_v1 }
 0x9b1   :  { %1078 = vpow2.f32 %v1020_v3 }
 0x9b5   :  { %v1077_v2 = vpop.eup %1076 }
 0x9b6   :  { %453 = vrot.lane.b32.xlu1 %v1077_v2, %s1149_s21 }
 0x9b7   :  { %v1079_v4 = vpop.eup %1078 }
 0x9b8   :  { %v431_v5 = vadd.f32 1.0, %v1079_v4 }
 0x9ba   :  { %1080 = vrcp.f32 %v431_v5  ;;  %v443_v7 = vand.u32 2147483648, %v431_v5  ;;  %vm437_vm3 = vweird.f32 %v431_v5  ;;  %v441_v13 = vand.u32 2147483647, %v431_v5 }
 0x9bc   :  { %v444_v15 = vor.u32 1.1754944e-38, %v443_v7  ;;  %vm442_vm6 = vcmp.eq.f32.partialorder %v441_v13, 8.507059e+37 }
 0x9c0   :  { %v1081_v6 = vpop.eup %1080 }
 0x9c1   :  { %v433_v8 = vmul.f32 %v1081_v6, %v431_v5  ;;  %vm438_vm0 = vweird.f32 %v1081_v6 }
 0x9c2   :  { %vm439_vm4 = vmor %vm437_vm3, %vm438_vm0  ;;  %vm145_vm3 = vcmask 253952  }
 0x9c3   :  { %v434_v10 = vsub.f32 1.0, %v433_v8 }
 0x9c5   :  { %v435_v11 = vmul.f32 %v1081_v6, %v434_v10 }
 0x9c7   :  { %v436_v12 = vadd.f32 %v1081_v6, %v435_v11 }
 0x9c9   :  { %v440_v14 = vsel %vm439_vm4, %v1081_v6, %v436_v12  ;;  %vm761_vm4 = vcmask 130112  }
 0x9ca   :  { %v445_v17 = vsel %vm442_vm6, %v444_v15, %v440_v14  ;;  %vm765_vm6 = vcmask 195712  }
 0x9cb   :  { %v451_v20 = vmul.f32 %v449_v19, %v445_v17 }
 0xa28   :  { %v454_v16 = vpop.permute.xlu1 %453 }
 0xa29   :  { %v456_v18 = vmul.f32 %v454_v16, %v445_v17 }
 0xa2b   :  { %458 = vrot.lane.b32.xlu2 %v456_v18, %s1149_s21 }
 0xa85   :  { %v459_v21 = vpop.permute.xlu2 %458 }
 0xa86   :  { %v461_v22 = vadd.f32 %v459_v21, %v451_v20 }
 0xa88   :  { %1082 = vtanh.f32 %v461_v22  ;;  %v529_v48 = vrot.slane %v461_v22, 6 }
 0xa8e   :  { %v1083_v23 = vpop.eup %1082 }
 0xa8f   :  { %464 = vrot.lane.b32.xlu0 %v1083_v23, %s1149_s21 }
 0xb01   :  { %v465_v24 = vpop.permute.xlu0 %464 }
 0xb02   :  { %v1277_v25 = vmul.f32 %v465_v24, %v445_v17 }
 0xb04   :  { %480 = vrot.lane.b32.xlu1 %v1277_v25, %s1150_s3 }
 0xb76   :  { %v481_v26 = vpop.permute.xlu1 %480 }
 0xb77   :  { %1021 = vmatmul.msk.f32.vlgmr.msrb.gmra.mxu3 %vm73_vm5, %v481_v26 }
 0xbfa   :  { %v501_v29 = vpop.f32.mrf.mxu3 }
 0xbfb   :  { %v505_v30 = vrot.slane %v501_v29, 6 }
 0xbfd   :  { %v507_v31 = vadd.f32 %v505_v30, %v1271_v63 }
 0xbff   :  { %1084 = vtanh.f32 %v507_v31  ;;  %v1022_v34 = vmul.f32 -1.442695, %v507_v31 }
 0xc01   :  { %1086 = vpow2.f32 %v1022_v34 }
 0xc05   :  { %v1085_v32 = vpop.eup %1084 }
 0xc06   :  { %533 = vrot.lane.b32.xlu2 %v1085_v32, %s1149_s21 }
 0xc07   :  { %v1087_v35 = vpop.eup %1086 }
 0xc08   :  { %v511_v36 = vadd.f32 1.0, %v1087_v35 }
 0xc0a   :  { %1088 = vrcp.f32 %v511_v36  ;;  %v523_v42 = vand.u32 2147483648, %v511_v36  ;;  %vm517_vm8 = vweird.f32 %v511_v36  ;;  %v521_v43 = vand.u32 2147483647, %v511_v36 }
 0xc0c   :  { %v524_v45 = vor.u32 1.1754944e-38, %v523_v42  ;;  %vm522_vm10 = vcmp.eq.f32.partialorder %v521_v43, 8.507059e+37 }
 0xc10   :  { %v1089_v37 = vpop.eup %1088 }
 0xc11   :  { %v513_v38 = vmul.f32 %v1089_v37, %v511_v36  ;;  %vm518_vm7 = vweird.f32 %v1089_v37 }
 0xc12   :  { %vm519_vm9 = vmor %vm517_vm8, %vm518_vm7  ;;  %vm769_vm7 = vcmask 261312   ;;  %vm771_vm8 = vcmask 1041409  }
 0xc13   :  { %v514_v39 = vsub.f32 1.0, %v513_v38  ;;  %v223_v38 = vperm.slane %v1252_v28, 0 }
 0xc15   :  { %v515_v40 = vmul.f32 %v1089_v37, %v514_v39  ;;  %v392_v39 = vperm.slane %v389_v55, 0 }
 0xc17   :  { %v516_v41 = vadd.f32 %v1089_v37, %v515_v40  ;;  %v469_v40 = vrot.slane %v1277_v25, 1 }
 0xc19   :  { %v520_v44 = vsel %vm519_vm9, %v1089_v37, %v516_v41  ;;  %v137_v37 = vperm.slane %v1235_v33, 0  ;;  %v471_v41 = vperm.slane %v469_v40, 0  ;;  %vm799_vm9 = vcmask 58368  }
 0xc1a   :  { %v525_v46 = vsel %vm522_vm10, %v524_v45, %v520_v44 }
 0xc1b   :  { %v531_v49 = vmul.f32 %v529_v48, %v525_v46 }
 0xc60   :  { %v534_v9 = vpop.permute.xlu2 %533 }
 0xc61   :  { %v536_v47 = vmul.f32 %v534_v9, %v525_v46 }
 0xc63   :  { %538 = vrot.lane.b32.xlu0 %v536_v47, %s1149_s21 }
 0xcd5   :  { %v539_v50 = vpop.permute.xlu0 %538 }
 0xcd6   :  { %v541_v51 = vadd.f32 %v539_v50, %v531_v49 }
 0xcd8   :  { %1090 = vtanh.f32 %v541_v51  ;;  %v614_v18 = vrot.slane %v541_v51, 6 }
 0xcde   :  { %v1091_v52 = vpop.eup %1090 }
 0xcdf   :  { %544 = vrot.lane.b32.xlu1 %v1091_v52, %s1149_s21 }
 0xd51   :  { %v545_v53 = vpop.permute.xlu1 %544 }
 0xd52   :  { %v547_v54 = vmul.f32 %v545_v53, %v525_v46 }
 0xd54   :  { %v564_v59 = vrot.slane %v547_v54, 2  ;;  %549 = vst [vmem:[#allocation1] sm:$0xff] %v547_v54 }
 0xd56   :  { %565 = vrot.lane.b32.xlu2 %v564_v59, %s1150_s3  ;;  %v136_v59 = vrot.slane %v1235_v33, 1 }
 0xd5b   :  { %v1297_v26 = vld [vmem:[#allocation1 + $0x2] ss:$9 sm:$0xff] }
 0xd5c   :  { %v1299_v29 = vld [vmem:[#allocation1 + $0x3] ss:$9 sm:$0xff] }
 0xdb0   :  { %v566_v60 = vpop.permute.xlu2 %565 }
 0xdb1   :  { %1023 = vmatmul.msk.f32.vlgmr.msrb.gmra.mxu0 %vm73_vm5, %v566_v60 }
 0xe2e   :  { %v586_v61 = vpop.f32.mrf.mxu0 }
 0xe2f   :  { %v590_v62 = vrot.slane %v586_v61, 4  ;;  %v138_v61 = vperm.slane %v136_v59, 0 }
 0xe31   :  { %v592_v0 = vadd.f32 %v590_v62, %v1271_v63 }
 0xe33   :  { %1092 = vtanh.f32 %v592_v0  ;;  %v1024_v2 = vmul.f32 -1.442695, %v592_v0  ;;  %v307_v0 = vperm.slane %v1260_v57, 0 }
 0xe35   :  { %1094 = vpow2.f32 %v1024_v2  ;;  %v393_v2 = vperm.slane %v1286_v56, 0 }
 0xe39   :  { %v1093_v1 = vpop.eup %1092 }
 0xe3a   :  { %618 = vrot.lane.b32.xlu0 %v1093_v1, %s1149_s21 }
 0xe3b   :  { %v1095_v3 = vpop.eup %1094 }
 0xe3c   :  { %v596_v4 = vadd.f32 1.0, %v1095_v3  ;;  %v554_v3 = vperm.slane %v1297_v26, 0 }
 0xe3e   :  { %1096 = vrcp.f32 %v596_v4  ;;  %v608_v12 = vand.u32 2147483648, %v596_v4  ;;  %vm602_vm12 = vweird.f32 %v596_v4  ;;  %v606_v7 = vand.u32 2147483647, %v596_v4 }
 0xe40   :  { %v609_v14 = vor.u32 1.1754944e-38, %v608_v12  ;;  %vm607_vm14 = vcmp.eq.f32.partialorder %v606_v7, 8.507059e+37 }
 0xe44   :  { %v1097_v5 = vpop.eup %1096 }
 0xe45   :  { %v598_v6 = vmul.f32 %v1097_v5, %v596_v4  ;;  %vm603_vm11 = vweird.f32 %v1097_v5 }
 0xe46   :  { %vm604_vm13 = vmor %vm602_vm12, %vm603_vm11 }
 0xe47   :  { %v599_v8 = vsub.f32 1.0, %v598_v6 }
 0xe49   :  { %v600_v10 = vmul.f32 %v1097_v5, %v599_v8 }
 0xe4b   :  { %v601_v11 = vadd.f32 %v1097_v5, %v600_v10 }
 0xe4d   :  { %v605_v13 = vsel %vm604_vm13, %v1097_v5, %v601_v11 }
 0xe4e   :  { %v610_v16 = vsel %vm607_vm14, %v609_v14, %v605_v13  ;;  %v222_v13 = vperm.slane %v1250_v27, 0  ;;  %v555_v27 = vperm.slane %v1299_v29, 0 }
 0xe4f   :  { %v616_v19 = vmul.f32 %v614_v18, %v610_v16 }
 0xeac   :  { %v619_v15 = vpop.permute.xlu0 %618 }
 0xead   :  { %v621_v17 = vmul.f32 %v619_v15, %v610_v16  ;;  %v308_v15 = vperm.slane %v1262_v58, 0  ;;  %v736_v58 = vld [vmem:[%s1417_s4] sm:$0xff] }
 0xeaf   :  { %623 = vrot.lane.b32.xlu1 %v621_v17, %s1149_s21  ;;  %v470_v17 = vperm.slane %v1277_v25, 0 }
 0xf21   :  { %v624_v20 = vpop.permute.xlu1 %623 }
 0xf22   :  { %v1293_v21 = vadd.f32 %v624_v20, %v616_v19  ;;  %v1151_v19 = vmov 16  }
 0xf23   :  { %1036 = vset.pattern.permute.xlu0 %v1151_v19  ;;  %1037 = vset.pattern.permute.xlu1 %v1151_v19 }
 0xf24   :  { %1098 = vtanh.f32 %v1293_v21  ;;  %v699_v6 = vrot.slane %v1293_v21, 6  ;;  %1035 = vset.pattern.permute.xlu2 %v1151_v19  ;;  %v739_v21 = vld [vmem:[%s1417_s4 + $0x18] sm:$0xff] }
 0xf25   :  { %911 = vmatpush.msra.mxu2 %v739_v21 }
 0xf2a   :  { %v1099_v22 = vpop.eup %1098 }
 0xf2b   :  { %629 = vrot.lane.b32.xlu2 %v1099_v22, %s1149_s21  ;;  %v738_v22 = vld [vmem:[%s1417_s4 + $0x10] sm:$0xff] }
 0xf2c   :  { %912 = vmatpush.msra.mxu2 %v738_v22 }
 0xf85   :  { %v630_v23 = vpop.permute.xlu2 %629 }
 0xf86   :  { %v632_v24 = vmul.f32 %v630_v23, %v610_v16  ;;  %v737_v23 = vld [vmem:[%s1417_s4 + $0x8] sm:$0xff] }
 0xf87   :  { %913 = vmatpush.msra.mxu2 %v737_v23 }
 0xf88   :  { %v649_v30 = vrot.slane %v632_v24, 4  ;;  %634 = vst [vmem:[#allocation1] sm:$0xff] %v632_v24 }
 0xf89   :  { %914 = vmatpush.msra.mxu2 %v736_v58 }
 0xf8a   :  { %650 = vrot.lane.b32.xlu0 %v649_v30, %s1150_s3 }
 0xf8f   :  { %v638_v4 = vld [vmem:[#allocation1 + $0x5] ss:$9 sm:$0xff] }
 0xf90   :  { %v640_v57 = vperm.slane %v638_v4, 0 }
 0xffc   :  { %v651_v31 = vpop.permute.xlu0 %650 }
 0xffd   :  { %1025 = vmatmul.msk.f32.vlgmr.msra.gmra.mxu1 %vm73_vm5, %v651_v31 }
0x107a   :  { %v671_v32 = vpop.f32.mrf.mxu1 }
0x107b   :  { %v675_v34 = vrot.slane %v671_v32, 2 }
0x107d   :  { %v677_v35 = vadd.f32 %v675_v34, %v1271_v63  ;;  %v636_v63 = vld [vmem:[#allocation1 + $0x4] ss:$9 sm:$0xff] }
0x107e   :  { %v639_v42 = vperm.slane %v636_v63, 0 }
0x107f   :  { %1100 = vtanh.f32 %v677_v35  ;;  %v1026_v43 = vmul.f32 -1.442695, %v677_v35 }
0x1081   :  { %1102 = vpow2.f32 %v1026_v43 }
0x1085   :  { %v1101_v36 = vpop.eup %1100 }
0x1086   :  { %703 = vrot.lane.b32.xlu1 %v1101_v36, %s1149_s21 }
0x1087   :  { %v1103_v44 = vpop.eup %1102 }
0x1088   :  { %v681_v45 = vadd.f32 1.0, %v1103_v44 }
0x108a   :  { %1104 = vrcp.f32 %v681_v45  ;;  %v693_v49 = vand.u32 2147483648, %v681_v45  ;;  %vm687_vm1 = vweird.f32 %v681_v45  ;;  %v691_v50 = vand.u32 2147483647, %v681_v45 }
0x108c   :  { %v694_v52 = vor.u32 1.1754944e-38, %v693_v49  ;;  %vm692_vm0 = vcmp.eq.f32.partialorder %v691_v50, 8.507059e+37 }
0x108e   :  { %139 = vrot.lane.b32.xlu1 %v137_v37, %s1150_s3  ;;  %v756_v37 = vlaneseq }
0x1090   :  { %v1105_v28 = vpop.eup %1104  ;;  %v1363_v40 = vand.u32 127, %v756_v37 }
0x1091   :  { %v683_v9 = vmul.f32 %v1105_v28, %v681_v45  ;;  %vm688_vm15 = vweird.f32 %v1105_v28 }
0x1092   :  { %vm689_vm2 = vmor %vm687_vm1, %vm688_vm15  ;;  %v763_v63 = vadd.s32 4294967280, %v1363_v40 }
0x1093   :  { %v684_v46 = vsub.f32 1.0, %v683_v9 }
0x1095   :  { %v685_v47 = vmul.f32 %v1105_v28, %v684_v46 }
0x1096   :  { %226 = vrot.lane.b32.xlu1 %v223_v38, %s1150_s3 }
0x1097   :  { %v686_v48 = vadd.f32 %v1105_v28, %v685_v47 }
0x1099   :  { %v690_v51 = vsel %vm689_vm2, %v1105_v28, %v686_v48 }
0x109a   :  { %v695_v54 = vsel %vm692_vm0, %v694_v52, %v690_v51  ;;  %vm926_vm0 = vcmask 130048  }
0x109b   :  { %v701_v8 = vmul.f32 %v699_v6, %v695_v54 }
0x109e   :  { %394 = vrot.lane.b32.xlu1 %v392_v39, %s1150_s3 }
0x10a6   :  { %474 = vrot.lane.b32.xlu1 %v471_v41, %s1150_s3  ;;  %v759_v41 = vadd.s32 4294967288, %v1363_v40 }
0x10ae   :  { %641 = vrot.lane.b32.xlu1 %v639_v42, %s1150_s3  ;;  %v767_v42 = vadd.s32 4294967272, %v1363_v40 }
0x10f8   :  { %v704_v53 = vpop.permute.xlu1 %703 }
0x10f9   :  { %v706_v55 = vmul.f32 %v704_v53, %v695_v54 }
0x10fb   :  { %708 = vrot.lane.b32.xlu2 %v706_v55, %s1149_s21 }
0x1100   :  { %v140_v60 = vpop.permute.xlu1 %139 }
0x1101   :  { %146 = vst.msk [vmem:[#allocation2] sm:$0x1] %vm145_vm3, %v140_v60 }
0x1103   :  { %141 = vrot.lane.b32.xlu2 %v138_v61, %s1150_s3 }
0x1108   :  { %v227_v62 = vpop.permute.xlu1 %226 }
0x1109   :  { %231 = vst.msk [vmem:[#allocation2 + $0x9] sm:$0x1] %vm145_vm3, %v227_v62 }
0x110b   :  { %309 = vrot.lane.b32.xlu2 %v307_v0, %s1150_s3 }
0x1110   :  { %v395_v1 = vpop.permute.xlu1 %394 }
0x1111   :  { %400 = vst.msk [vmem:[#allocation2 + $0x3] sm:$0x1] %vm145_vm3, %v395_v1 }
0x1113   :  { %396 = vrot.lane.b32.xlu2 %v393_v2, %s1150_s3 }
0x1118   :  { %v475_v33 = vpop.permute.xlu1 %474 }
0x1119   :  { %479 = vst.msk [vmem:[#allocation2 + $0xc] sm:$0x1] %vm145_vm3, %v475_v33  ;;  %v1152_v33 = vmov 0  }
0x111b   :  { %556 = vrot.lane.b32.xlu2 %v554_v3, %s1150_s3 }
0x1120   :  { %v642_v5 = vpop.permute.xlu1 %641 }
0x1121   :  { %647 = vst.msk [vmem:[#allocation2 + $0x6] sm:$0x1] %vm145_vm3, %v642_v5 }
0x1123   :  { %643 = vrot.lane.b32.xlu2 %v640_v57, %s1150_s3 }
0x112b   :  { %745 = vperm.xlu2 %1035, %v736_v58  }
0x1133   :  { %754 = vperm.xlu2 %1035, %v739_v21  }
0x113b   :  { %1038 = vset.pattern.permute.xlu2 %v1152_v33 }
0x1155   :  { %v709_v56 = vpop.permute.xlu2 %708 }
0x1156   :  { %v711_v10 = vadd.f32 %v709_v56, %v701_v8 }
0x1158   :  { %1106 = vtanh.f32 %v711_v10 }
0x115d   :  { %v142_v11 = vpop.permute.xlu2 %141 }
0x115e   :  { %v1107_v12 = vpop.eup %1106  ;;  %147 = vst.msk [vmem:[#allocation2 + $0x8] sm:$0x1] %vm145_vm3, %v142_v11 }
0x115f   :  { %714 = vrot.lane.b32.xlu0 %v1107_v12, %s1149_s21 }
0x1165   :  { %v310_v7 = vpop.permute.xlu2 %309 }
0x1166   :  { %315 = vst.msk [vmem:[#allocation2 + $0x2] sm:$0x1] %vm145_vm3, %v310_v7 }
0x1167   :  { %224 = vrot.lane.b32.xlu0 %v222_v13, %s1150_s3 }
0x116d   :  { %v397_v14 = vpop.permute.xlu2 %396 }
0x116e   :  { %401 = vst.msk [vmem:[#allocation2 + $0xb] sm:$0x1] %vm145_vm3, %v397_v14 }
0x116f   :  { %311 = vrot.lane.b32.xlu0 %v308_v15, %s1150_s3 }
0x1175   :  { %v557_v16 = vpop.permute.xlu2 %556 }
0x1176   :  { %562 = vst.msk [vmem:[#allocation2 + $0x5] sm:$0x1] %vm145_vm3, %v557_v16 }
0x1177   :  { %472 = vrot.lane.b32.xlu0 %v470_v17, %s1150_s3 }
0x117d   :  { %v644_v18 = vpop.permute.xlu2 %643 }
0x117e   :  { %648 = vst.msk [vmem:[#allocation2 + $0xe] sm:$0x1] %vm145_vm3, %v644_v18 }
0x117f   :  { %558 = vrot.lane.b32.xlu0 %v555_v27, %s1150_s3 }
0x1185   :  { %v746_v36 = vpop.permute.xlu2 %745 }
0x1186   :  { %v758_v28 = vperm.slane %v746_v36, %v1363_v40 }
0x118d   :  { %v755_v43 = vpop.permute.xlu2 %754 }
0x118e   :  { %v768_v47 = vperm.slane %v755_v43, %v767_v42 }
0x11d1   :  { %v715_v25 = vpop.permute.xlu0 %714 }
0x11d2   :  { %v717_v20 = vmul.f32 %v715_v25, %v695_v54 }
0x11d4   :  { %719 = vst [vmem:[#allocation1] sm:$0xff] %v717_v20 }
0x11d9   :  { %v225_v24 = vpop.permute.xlu0 %224 }
0x11da   :  { %230 = vst.msk [vmem:[#allocation2 + $0x1] sm:$0x1] %vm145_vm3, %v225_v24 }
0x11db   :  { %v721_v26 = vld [vmem:[#allocation1 + $0x6] ss:$9 sm:$0xff] }
0x11dc   :  { %v723_v29 = vld [vmem:[#allocation1 + $0x7] ss:$9 sm:$0xff]  ;;  %v724_v30 = vperm.slane %v721_v26, 0 }
0x11dd   :  { %v725_v31 = vperm.slane %v723_v29, 0 }
0x11de   :  { %726 = vrot.lane.b32.xlu0 %v724_v30, %s1150_s3 }
0x11df   :  { %728 = vrot.lane.b32.xlu1 %v725_v31, %s1150_s3 }
0x11e1   :  { %v312_v32 = vpop.permute.xlu0 %311 }
0x11e2   :  { %316 = vst.msk [vmem:[#allocation2 + $0xa] sm:$0x1] %vm145_vm3, %v312_v32 }
0x11e6   :  { %748 = vperm.xlu0 %1036, %v737_v23  }
0x11e7   :  { %751 = vperm.xlu1 %1037, %v738_v22  }
0x11e9   :  { %v473_v34 = vpop.permute.xlu0 %472 }
0x11ea   :  { %478 = vst.msk [vmem:[#allocation2 + $0x4] sm:$0x1] %vm145_vm3, %v473_v34 }
0x11ee   :  { %1040 = vset.pattern.permute.xlu0 %v1152_v33 }
0x11ef   :  { %1039 = vset.pattern.permute.xlu1 %v1152_v33 }
0x11f1   :  { %v559_v35 = vpop.permute.xlu0 %558 }
0x11f2   :  { %563 = vst.msk [vmem:[#allocation2 + $0xd] sm:$0x1] %vm145_vm3, %v559_v35 }
0x1250   :  { %v727_v38 = vpop.permute.xlu0 %726 }
0x1251   :  { %v729_v39 = vpop.permute.xlu1 %728  ;;  %732 = vst.msk [vmem:[#allocation2 + $0x7] sm:$0x1] %vm145_vm3, %v727_v38 }
0x1252   :  { %733 = vst.msk [vmem:[#allocation2 + $0xf] sm:$0x1] %vm145_vm3, %v729_v39 }
0x1258   :  { %v749_v44 = vpop.permute.xlu0 %748  ;;  %v1371_v52 = vld [vmem:[#allocation2] sm:$0xff] }
0x1259   :  { %v752_v45 = vpop.permute.xlu1 %751  ;;  %v760_v9 = vperm.slane %v749_v44, %v759_v41  ;;  %v1369_v50 = vld [vmem:[#allocation2 + $0x8] sm:$0xff]  ;;  %v921_v44 = vld [vmem:[%s1419_s6 + $0x8] sm:$0xff] }
0x125a   :  { %v764_v46 = vperm.slane %v752_v45, %v763_v63  ;;  %944 = vmatpush.msra.mxu3 %v921_v44 }
0x125b   :  { %v762_v48 = vsel %vm761_vm4, %v760_v9, %v758_v28 }
0x125c   :  { %v766_v49 = vsel %vm765_vm6, %v764_v46, %v762_v48 }
0x125d   :  { %v770_v51 = vsel %vm769_vm7, %v768_v47, %v766_v49 }
0x125e   :  { %v786_v53 = vmul.f32 %v770_v51, %v1369_v50  ;;  %v785_v54 = vmul.f32 %v770_v51, %v1371_v52 }
0x1260   :  { %v790_v55 = vsel %vm73_vm5, %v786_v53, 0.0  ;;  %v787_v59 = vsel %vm73_vm5, %v785_v54, 0.0 }
0x1261   :  { %791 = vadd.xlane.f32.xlu2 %v790_v55  ;;  %788 = vadd.xlane.f32.xlu1 %v787_v59 }
0x12d4   :  { %v792_v60 = vpop.xlane.xlu2 %791  ;;  %v789_v61 = vpop.xlane.xlu1 %788 }
0x12d5   :  { %v796_v62 = vperm.slane %v792_v60, %v1363_v40  ;;  %v795_v0 = vperm.slane %v789_v61, %v1363_v40 }
0x12d7   :  { %v797_v1 = vsel %vm771_vm8, %v796_v62, %v795_v0 }
0x12d8   :  { %v800_v2 = vsel %vm799_vm9, %v797_v1, -inf }
0x12d9   :  { %801 = vmax.xlane.f32.xlu0 %v800_v2 }
0x134c   :  { %v802_v3 = vpop.xlane.xlu0 %801 }
0x134d   :  { %v804_v4 = vperm.slane %v802_v3, 0  ;;  %v805_v5 = vperm.slane %v802_v3, 1  ;;  %v1042_v3 = vld [vmem:[%s1418_s5] ss:$0 sm:$0xff]  ;;  %s1153_s5 = smov [#allocation3]  }
0x134f   :  { %v808_v57 = vsub.f32 %v789_v61, %v804_v4  ;;  %v809_v6 = vsub.f32 %v792_v60, %v805_v5 }
0x1351   :  { %v810_v8 = vmul.f32 1.442695, %v808_v57  ;;  %v812_v56 = vmul.f32 1.442695, %v809_v6  ;;  %v1043_v6 = vld [vmem:[%s1420_s7] ss:$0 sm:$0xff] }
0x1353   :  { %1108 = vpow2.f32 %v810_v8 }
0x1354   :  { %1110 = vpow2.f32 %v812_v56 }
0x1359   :  { %v1109_v10 = vpop.eup %1108 }
0x135a   :  { %v1111_v11 = vpop.eup %1110  ;;  %817 = vperm.xlu2 %1038, %v1109_v10  }
0x135b   :  { %820 = vperm.xlu1 %1039, %v1111_v11  }
0x13b4   :  { %v818_v12 = vpop.permute.xlu2 %817 }
0x13b5   :  { %v822_v13 = vperm.slane %v818_v12, %v1363_v40 }
0x13cd   :  { %v821_v7 = vpop.permute.xlu1 %820 }
0x13ce   :  { %v823_v14 = vperm.slane %v821_v7, %v1363_v40 }
0x13d0   :  { %v824_v15 = vsel %vm771_vm8, %v823_v14, %v822_v13 }
0x13d1   :  { %v826_v16 = vsel %vm799_vm9, %v824_v15, 0.0 }
0x13d2   :  { %827 = vadd.xlane.f32.xlu0 %v826_v16 }
0x1445   :  { %v828_v17 = vpop.xlane.xlu0 %827 }
0x1446   :  { %v830_v18 = vperm.slane %v828_v17, 0  ;;  %v831_v27 = vperm.slane %v828_v17, 1 }
0x1448   :  { %1112 = vrcp.f32 %v830_v18  ;;  %v845_v23 = vand.u32 2147483648, %v830_v18  ;;  %v860_v24 = vand.u32 2147483648, %v831_v27  ;;  %v843_v29 = vand.u32 2147483647, %v830_v18 }
0x1449   :  { %1114 = vrcp.f32 %v831_v27  ;;  %v858_v31 = vand.u32 2147483647, %v831_v27  ;;  %vm839_vm12 = vweird.f32 %v830_v18  ;;  %vm854_vm13 = vweird.f32 %v831_v27 }
0x144a   :  { %v846_v35 = vor.u32 1.1754944e-38, %v845_v23  ;;  %v861_v36 = vor.u32 1.1754944e-38, %v860_v24  ;;  %vm844_vm1 = vcmp.eq.f32.partialorder %v843_v29, 8.507059e+37 }
0x144b   :  { %vm859_vm2 = vcmp.eq.f32.partialorder %v858_v31, 8.507059e+37 }
0x144e   :  { %v1113_v19 = vpop.eup %1112 }
0x144f   :  { %v1115_v58 = vpop.eup %1114  ;;  %v835_v25 = vmul.f32 %v1113_v19, %v830_v18  ;;  %vm840_vm10 = vweird.f32 %v1113_v19 }
0x1450   :  { %v850_v20 = vmul.f32 %v1115_v58, %v831_v27  ;;  %vm855_vm11 = vweird.f32 %v1115_v58  ;;  %vm841_vm14 = vmor %vm839_vm12, %vm840_vm10  ;;  %vm983_vm10 = vcmask 66560  }
0x1451   :  { %v836_v21 = vsub.f32 1.0, %v835_v25  ;;  %vm856_vm15 = vmor %vm854_vm13, %vm855_vm11 }
0x1452   :  { %v851_v22 = vsub.f32 1.0, %v850_v20 }
0x1453   :  { %v837_v26 = vmul.f32 %v1113_v19, %v836_v21 }
0x1454   :  { %v852_v30 = vmul.f32 %v1115_v58, %v851_v22 }
0x1455   :  { %v838_v32 = vadd.f32 %v1113_v19, %v837_v26 }
0x1456   :  { %v853_v34 = vadd.f32 %v1115_v58, %v852_v30 }
0x1457   :  { %v842_v37 = vsel %vm841_vm14, %v1113_v19, %v838_v32 }
0x1458   :  { %v857_v38 = vsel %vm856_vm15, %v1115_v58, %v853_v34  ;;  %v847_v39 = vsel %vm844_vm1, %v846_v35, %v842_v37 }
0x1459   :  { %v862_v41 = vsel %vm859_vm2, %v861_v36, %v857_v38  ;;  %v848_v63 = vmul.f32 %v1109_v10, %v847_v39 }
0x145a   :  { %v863_v42 = vmul.f32 %v1111_v11, %v862_v41 }
0x145b   :  { %866 = vperm.xlu0 %1040, %v848_v63  }
0x145c   :  { %871 = vperm.xlu2 %1038, %v863_v42  }
0x14b6   :  { %v872_v43 = vpop.permute.xlu2 %871 }
0x14b7   :  { %v875_v45 = vmul.f32 %v872_v43, %v1369_v50  ;;  %v986_v48 = vperm.slane %v872_v43, %v1363_v40 }
0x14b9   :  { %v883_v28 = vsel %vm73_vm5, %v875_v45, 0.0 }
0x14ba   :  { %v884_v9 = vrot.slane %v883_v28, 4 }
0x14bc   :  { %v885_v46 = vadd.f32 %v884_v9, %v883_v28 }
0x14be   :  { %v886_v53 = vrot.slane %v885_v46, 2 }
0x14c0   :  { %v887_v50 = vadd.f32 %v886_v53, %v885_v46 }
0x14c2   :  { %v888_v62 = vrot.slane %v887_v50, 1 }
0x14c4   :  { %v889_v2 = vadd.f32 %v888_v62, %v887_v50 }
0x14cd   :  { %v867_v47 = vpop.permute.xlu0 %866 }
0x14ce   :  { %v874_v49 = vmul.f32 %v867_v47, %v1371_v52  ;;  %v985_v51 = vperm.slane %v867_v47, %v1363_v40  ;;  %v920_v40 = vld [vmem:[%s1419_s6] sm:$0xff]  ;;  %s997_s6 = sshll.u32 %s1153_s5, 4  ;;  %s998_s6 = int_to_ptr.vmem [resolvable:$true] %s997_s6 }
0x14cf   :  { %945 = vmatpush.msra.mxu3 %v920_v40 }
0x14d0   :  { %v876_v54 = vsel %vm73_vm5, %v874_v49, 0.0  ;;  %v987_v55 = vsel %vm771_vm8, %v986_v48, %v985_v51 }
0x14d1   :  { %v877_v59 = vrot.slane %v876_v54, 4  ;;  %989 = vst.msk [vmem:[#allocation3] sm:$0x3] %vm799_vm9, %v987_v55  ;;  %vm981_vm9 = vcmask 48128  }
0x14d2   :  { %1002 = dma.vmem_to_hbm [thread:$0]  %s998_s6, 32, %s1000_s19, [#allocation4]  }
0x14d3   :  { %v878_v60 = vadd.f32 %v877_v59, %v876_v54 }
0x14d5   :  { %v879_v61 = vrot.slane %v878_v60, 2 }
0x14d7   :  { %v880_v0 = vadd.f32 %v879_v61, %v878_v60 }
0x14d9   :  { %v881_v1 = vrot.slane %v880_v0, 1 }
0x14db   :  { %v882_v33 = vadd.f32 %v881_v1, %v880_v0 }
0x14dd   :  { %v896_v52 = vsel %vm771_vm8, %v889_v2, %v882_v33  ;;  %vm979_vm8 = vcmask 23552  }
0x14de   :  { %1027 = vmatmul.msk.f32.vlgmr.msra.gmra.mxu2 %vm73_vm5, %v896_v52  ;;  %vm950_vm5 = vcmask 17408  }
0x1561   :  { %v916_v4 = vpop.f32.mrf.mxu2 }
0x1562   :  { %v917_v5 = vadd.f32 %v1042_v3, %v916_v4 }
0x1564   :  { %v919_v57 = vmax.f32 %v917_v5, 0.0 }
0x1566   :  { %1028 = vmatmul.msk.f32.vlgmr.msra.gmra.mxu3 %vm926_vm0, %v919_v57 }
0x15e9   :  { %v947_v8 = vpop.f32.mrf.mxu3 }
0x15ea   :  { %v948_v56 = vadd.f32 %v1043_v6, %v947_v8 }
0x15ec   :  { %v951_v10 = vsel %vm950_vm5, %v948_v56, -inf  ;;  %v975_v16 = vmul.f32 1.442695, %v948_v56 }
0x15ed   :  { %952 = vmax.xlane.f32.xlu1 %v951_v10 }
0x1660   :  { %v953_v11 = vpop.xlane.xlu1 %952 }
0x1661   :  { %v954_v12 = vsub.f32 %v948_v56, %v953_v11 }
0x1663   :  { %v955_v7 = vmul.f32 1.442695, %v954_v12 }
0x1665   :  { %1116 = vpow2.f32 %v955_v7 }
0x166b   :  { %v1117_v13 = vpop.eup %1116 }
0x166c   :  { %v957_v14 = vsel %vm950_vm5, %v1117_v13, 0.0 }
0x166d   :  { %958 = vadd.xlane.f32.xlu2 %v957_v14 }
0x16e0   :  { %v959_v15 = vpop.xlane.xlu2 %958 }
0x16e1   :  { %1118 = vrcp.f32 %v959_v15  ;;  %v971_v19 = vand.u32 2147483648, %v959_v15  ;;  %v969_v20 = vand.u32 2147483647, %v959_v15  ;;  %vm965_vm4 = vweird.f32 %v959_v15 }
0x16e2   :  { %1120 = vpow2.f32 %v975_v16 }
0x16e3   :  { %v972_v23 = vor.u32 1.1754944e-38, %v971_v19  ;;  %vm970_vm7 = vcmp.eq.f32.partialorder %v969_v20, 8.507059e+37 }
0x16e7   :  { %v1119_v17 = vpop.eup %1118 }
0x16e8   :  { %v961_v18 = vmul.f32 %v1119_v17, %v959_v15  ;;  %v1121_v58 = vpop.eup %1120  ;;  %vm966_vm3 = vweird.f32 %v1119_v17 }
0x16e9   :  { %v977_v22 = vmax.f32 %v1121_v58, 0.001  ;;  %vm967_vm6 = vmor %vm965_vm4, %vm966_vm3 }
0x16ea   :  { %v962_v27 = vsub.f32 1.0, %v961_v18 }
0x16eb   :  { %v978_v30 = vmin.f32 %v977_v22, 1000.0 }
0x16ec   :  { %v963_v25 = vmul.f32 %v1119_v17, %v962_v27 }
0x16ee   :  { %v964_v21 = vadd.f32 %v1119_v17, %v963_v25 }
0x16f0   :  { %v968_v24 = vsel %vm967_vm6, %v1119_v17, %v964_v21 }
0x16f1   :  { %v973_v26 = vsel %vm970_vm7, %v972_v23, %v968_v24 }
0x16f2   :  { %v974_v29 = vmul.f32 %v1117_v13, %v973_v26 }
0x16f4   :  { %v980_v31 = vsel %vm979_vm8, %v974_v29, %v948_v56 }
0x16f5   :  { %v982_v32 = vsel %vm981_vm9, %v980_v31, %v978_v30 }
0x16f6   :  { %984 = vst.msk [vmem:[%s1421_s8] sm:$0x3] %vm983_vm10, %v982_v32 }
0x16f7   :  { %1146 = dma.done.wait [#allocation4], 32  }
0x16f8   :  { %1147 = vsyncadd [#allocation4], 4294967264 }
0x16f9   :  { %1009 = vsyncpa [#allocation4], 1 }

</bundles_post_ra>
